<compile_context>
chip_gen: v6e
topology: v6e:2x2x1
jax: 0.10.0
libtpu: 0.0.40
codegen_flags: <defaults>
</compile_context>

<pallas_src>
import functools
import math

import jax
import jax.numpy as jnp
from jax.experimental import pallas as pl
from jax.experimental.pallas import tpu as pltpu


# For an output pixel of parity e (0/1) along one spatial axis, tap t (0,1,2)
# of a 3x3 / stride-1 / pad-1 conv applied *after* PixelShuffle(2) reads the
# sub-pixel plane of parity SRC with an extra shift DELTA (in pre-shuffle
# units):  2*h + e + t - 1 == 2*(h + DELTA) + SRC.
_SUBPIXEL_TAPS = {
    0: ((1, -1), (0, 0), (1, 0)),
    1: ((0, 0), (1, 0), (0, 1)),
}


def _fused_shuffle_kernel(x_ref, w1_ref, b1_ref, w2_ref, b2_ref, wm_ref,
                          o_ref, col_ref, zp_ref, *, C, W, TH, lead):
    # x_ref  : (1, 1, C, Ltile)  padded input row tile (TH+4 rows, flat lanes)
    # w*_ref : (4C, 9C) bf16     im2col-layout weights (rows permuted)
    # b*_ref : (4C, 1)  f32
    # wm_ref : (2, (TH+2)*W) bf16  column-validity masks for dw = -1 / +1
    # o_ref  : (1, 16C, TH*W)    output tile, rows ordered (io, jo, i2, j2, c)
    # col_ref: (9C, (TH+2)*W) bf16  reused im2col scratch (conv1 and conv2)
    # zp_ref : (4C, W + (TH+2)*W + 8) bf16  padded sub-pixel planes of conv1
    TC = TH + 2                 # conv1 rows computed per tile (1-row halo)
    HW_c = TC * W               # lanes of the conv1 / zp interior
    HW_o = TH * W               # lanes of the output tile (per plane)
    base = W                    # zp interior origin (lane-aligned if W%128==0)

    t = pl.program_id(1)
    nt = pl.num_programs(1)

    mask_m1 = wm_ref[0:1, :]    # 1.0 where column (w - 1) is inside the image
    mask_p1 = wm_ref[1:2, :]    # 1.0 where column (w + 1) is inside the image

    # ---------------- Stage 1: conv1 as ONE K=9C bf16 matmul ----------------
    # The 9 tap patches are static lane slices of the pre-padded input tile;
    # they are written in place into the bf16 im2col scratch (no concat).
    for a in range(3):                       # tap row offset dh = a - 1
        for b in range(3):                   # tap col offset dw = b - 1
            tap = a * 3 + b
            start = lead + a * W + (b - 1)
            patch = x_ref[0, 0, :, start:start + HW_c]       # (C, HW_c) f32
            if b == 0:
                patch = patch * mask_m1
            elif b == 2:
                patch = patch * mask_p1
            col_ref[tap * C:(tap + 1) * C, :] = patch.astype(jnp.bfloat16)

    y1 = jnp.dot(w1_ref[...], col_ref[...],
                 preferred_element_type=jnp.float32) + b1_ref[...]  # (4C, HW_c)

    # -------- PixelShuffle #1: keep the 4 sub-pixel planes (no interleave) --
    # y1 rows are ordered (k, c) with k = 2*i + j, so plane k is rows
    # [k*C, (k+1)*C) of zp; store bf16 (conv2 consumes bf16 columns anyway).
    zp_ref[:, base:base + HW_c] = y1.astype(jnp.bfloat16)

    # Zero ONLY what stage 2 can read outside the interior:
    #  * the single lane before/after it (dw = -1/+1 corner reads; the masks
    #    kill them, but keep them finite so stale-VMEM NaNs can't leak), and
    #  * the out-of-image halo ROW on boundary tiles (true conv2 zero pad).
    # (Done every step: with "parallel" grid axes each core runs an arbitrary
    #  subset of steps, so a one-time init cannot be keyed on program_id.)
    zp_ref[:, base - 1:base] = jnp.zeros((4 * C, 1), jnp.bfloat16)
    zp_ref[:, base + HW_c:base + HW_c + 1] = jnp.zeros((4 * C, 1), jnp.bfloat16)

    @pl.when(t == 0)
    def _():
        zp_ref[:, base:base + W] = jnp.zeros((4 * C, W), jnp.bfloat16)

    @pl.when(t == nt - 1)
    def _():
        zp_ref[:, base + (TC - 1) * W:base + HW_c] = (
            jnp.zeros((4 * C, W), jnp.bfloat16))

    # ------ Stage 2: conv2 + PixelShuffle #2 via sub-pixel decomposition ----
    mask_m1o = wm_ref[0:1, :HW_o]
    mask_p1o = wm_ref[1:2, :HW_o]

    for io in range(2):          # conv2 output row parity
        for jo in range(2):      # conv2 output column parity
            # im2col for this parity, rewritten in place (bf16, no concat,
            # no cached patches kept live across parities).
            for a in range(3):
                src_i, dh = _SUBPIXEL_TAPS[io][a]
                for b in range(3):
                    src_j, dw = _SUBPIXEL_TAPS[jo][b]
                    k = 2 * src_i + src_j
                    tap = a * 3 + b
                    start = base + (1 + dh) * W + dw
                    patch = zp_ref[k * C:(k + 1) * C, start:start + HW_o]
                    if dw == -1:
                        patch = patch * mask_m1o
                    elif dw == 1:
                        patch = patch * mask_p1o
                    col_ref[tap * C:(tap + 1) * C, :HW_o] = patch

            u = jnp.dot(w2_ref[...], col_ref[:, :HW_o],
                        preferred_element_type=jnp.float32) + b2_ref[...]
            # One dense, sublane-aligned store per parity: output rows are
            # ordered (io, jo, i2, j2, c) so the whole (4C, HW_o) block of
            # this parity is contiguous.
            par = 2 * io + jo
            o_ref[0, par * 4 * C:(par + 1) * 4 * C, :] = u.astype(o_ref.dtype)


def _prep_conv_params(w_oihw, b, C):
    """PyTorch Conv2d(C, 4C, 3) params -> fused-kernel layout (bf16 weights).

    Rows are permuted so row (k*C + c) holds PyTorch output channel (c*4 + k),
    where k = 2*i + j is the PixelShuffle(2) sub-pixel index.  Columns follow
    the in-kernel im2col ordering (tap_a*3 + tap_b)*C + c_in.
    """
    Cout = w_oihw.shape[0]
    assert Cout == 4 * C
    w = w_oihw.reshape(C, 4, C, 3, 3)            # (c, k, ci, a, b)
    w = jnp.transpose(w, (1, 0, 3, 4, 2))        # (k, c, a, b, ci)
    w_mat = w.reshape(4 * C, 9 * C)
    b_col = b.reshape(C, 4).T.reshape(4 * C, 1)
    return w_mat.astype(jnp.bfloat16), b_col.astype(jnp.float32)


def _pick_tile_rows(H, W, C, out_itemsize, budget_bytes=24 * 1024 * 1024):
    """Largest row tile (divisor of H, lane-dense output tile) whose per-tile
    working set fits a budget sized for v7x's 64 MiB VMEM."""
    cands = [th for th in range(1, H + 1)
             if H % th == 0 and ((th * W) % 128 == 0 or th == H)]

    def tile_bytes(th):
        hw_o, hw_c = th * W, (th + 2) * W
        return (2 * 16 * C * hw_o * out_itemsize    # double-buffered out tile
                + 9 * C * hw_c * 2                  # bf16 im2col scratch
                + 4 * C * (hw_c + W + 8) * 2        # bf16 sub-pixel planes
                + 12 * C * hw_o * 4)                # f32 matmul transients

    fitting = [th for th in cands if tile_bytes(th) <= budget_bytes]
    return max(fitting) if fitting else min(cands)


def shuffle_forward(x_nchw, params, tile_rows=None):
    """Forward pass of Shuffle(in_channels, n=4).  Input/output in NCHW."""
    (w1, b1), (w2, b2) = params                  # PyTorch OIHW layout
    N, C, H, W = x_nchw.shape
    HW = H * W

    if tile_rows is None:
        tile_rows = _pick_tile_rows(H, W, C, x_nchw.dtype.itemsize)
    TH = tile_rows
    if H % TH != 0:
        raise ValueError(f"tile_rows={TH} must divide H={H}")
    if (TH * W) % 128 != 0 and TH != H:
        raise ValueError("tile_rows*W must be a multiple of 128 (or TH == H)")
    T = H // TH
    TC = TH + 2
    HW_c = TC * W
    lead, tail = W, 8                            # lead >= 1; aligned if W%128==0
    Ltile = lead + (TH + 4) * W + tail           # per-tile padded flat length

    w1m, b1c = _prep_conv_params(w1, b1, C)
    w2m, b2c = _prep_conv_params(w2, b2, C)

    # Column-validity masks for horizontal tap shifts of -1 / +1 (period W).
    w_idx = jnp.arange(HW_c, dtype=jnp.int32) % W
    wmask = jnp.stack([w_idx >= 1, w_idx <= W - 2]).astype(jnp.bfloat16)

    # Pre-pad rows (conv halo) and lanes once in the wrapper, then slice the
    # overlapping per-tile row windows (TH + 4 rows each).  This keeps every
    # 3x3 tap a static, in-bounds lane slice inside the kernel and lets the
    # pipeline DMA just one small input tile per step.
    x_pad = jnp.pad(x_nchw, ((0, 0), (0, 0), (2, 2), (0, 0)))
    x_flat = jnp.pad(x_pad.reshape(N, C, (H + 4) * W),
                     ((0, 0), (0, 0), (lead, tail)))
    x_tiles = jnp.stack(
        [x_flat[:, :, t * TH * W:t * TH * W + Ltile] for t in range(T)],
        axis=1)                                              # (N, T, C, Ltile)

    kernel = functools.partial(_fused_shuffle_kernel, C=C, W=W, TH=TH,
                               lead=lead)
    grid_spec = pltpu.PrefetchScalarGridSpec(
        num_scalar_prefetch=0,
        grid=(N, T),
        in_specs=[
            pl.BlockSpec((1, 1, C, Ltile), lambda n, t: (n, t, 0, 0)),
            pl.BlockSpec((4 * C, 9 * C), lambda n, t: (0, 0)),
            pl.BlockSpec((4 * C, 1), lambda n, t: (0, 0)),
            pl.BlockSpec((4 * C, 9 * C), lambda n, t: (0, 0)),
            pl.BlockSpec((4 * C, 1), lambda n, t: (0, 0)),
            pl.BlockSpec((2, HW_c), lambda n, t: (0, 0)),
        ],
        out_specs=pl.BlockSpec((1, 16 * C, TH * W), lambda n, t: (n, 0, t)),
        scratch_shapes=[
            pltpu.VMEM((9 * C, HW_c), jnp.bfloat16),          # shared im2col
            pltpu.VMEM((4 * C, W + HW_c + 8), jnp.bfloat16),  # sub-pixel planes
        ],
    )
    blocks = pl.pallas_call(
        kernel,
        out_shape=jax.ShapeDtypeStruct((N, 16 * C, HW), x_nchw.dtype),
        grid_spec=grid_spec,
        compiler_params=pltpu.CompilerParams(
            dimension_semantics=("parallel", "parallel"),  # shards 2 TCs (v7x)
            vmem_limit_bytes=48 * 1024 * 1024),
    )(x_tiles, w1m, b1c, w2m, b2c, wmask)

    # Final depth-to-space.  Kernel rows are ordered (io, jo, i2, j2, c):
    #   out[n, c, 4h + 2*io + i2, 4w + 2*jo + j2] = blocks[n, row, h*W + w].
    # TODO(synk): fuse the column (jo, j2) interleave in-kernel with XLU rolls
    # so this wrapper transpose only touches whole-row contiguous segments.
    blocks = blocks.reshape(N, 2, 2, 2, 2, C, H, W)
    out = jnp.transpose(blocks, (0, 5, 6, 1, 3, 7, 2, 4))
    return out.reshape(N, C, 4 * H, 4 * W)


def init_params(key, in_channels):
    """Deterministic params in PyTorch Conv2d layout: ((OIHW, bias), ...)."""
    k1, k2, k3, k4 = jax.random.split(key, 4)
    C, Cout = in_channels, 4 * in_channels
    bound = 1.0 / math.sqrt(C * 9)
    w1 = jax.random.uniform(k1, (Cout, C, 3, 3), jnp.float32, -bound, bound)
    b1 = jax.random.uniform(k2, (Cout,), jnp.float32, -bound, bound)
    w2 = jax.random.uniform(k3, (Cout, C, 3, 3), jnp.float32, -bound, bound)
    b2 = jax.random.uniform(k4, (Cout,), jnp.float32, -bound, bound)
    return ((w1, b1), (w2, b2))


def _pixel_shuffle_ref(x, r):
    """PixelShuffle(r), NCHW, PyTorch channel ordering."""
    N, Crr, H, W = x.shape
    C = Crr // (r * r)
    x = x.reshape(N, C, r, r, H, W)
    x = jnp.transpose(x, (0, 1, 4, 2, 5, 3))
    return x.reshape(N, C, H * r, W * r)


def _reference_forward(x_nchw, params):
    """Pure-JAX f32 reference (lax conv) for correctness checking."""
    (w1, b1), (w2, b2) = params

    def conv(x, w, b):
        y = jax.lax.conv_general_dilated(
            x, w, window_strides=(1, 1), padding=((1, 1), (1, 1)),
            dimension_numbers=("NCHW", "OIHW", "NCHW"),
            precision=jax.lax.Precision.HIGHEST)
        return y + b[None, :, None, None]

    y = _pixel_shuffle_ref(conv(x_nchw, w1, b1), 2)
    y = _pixel_shuffle_ref(conv(y, w2, b2), 2)
    return y


if __name__ == "__main__":
    key = jax.random.PRNGKey(0)
    kx, kp = jax.random.split(key)

    N, C, H, W = 2, 4, 16, 16
    x = jax.random.normal(kx, (N, C, H, W), jnp.float32)
    params = init_params(kp, C)

    ref = _reference_forward(x, params)

    # Multi-tile path (2 row tiles, exercises the halo logic).
    fwd_tiled = jax.jit(functools.partial(shuffle_forward, tile_rows=8))
    out = jax.block_until_ready(fwd_tiled(x, params))
    assert out.shape == (N, C, 4 * H, 4 * W), out.shape
    # bf16 MXU operands -> looser tolerance than the previous f32 kernel.
    assert jnp.allclose(out, ref, atol=3e-2, rtol=3e-2), \
        float(jnp.max(jnp.abs(out - ref)))

    # Auto tile selection (single tile at this size) must agree as well.
    fwd_auto = jax.jit(shuffle_forward)
    out2 = jax.block_until_ready(fwd_auto(x, params))
    assert jnp.allclose(out2, ref, atol=3e-2, rtol=3e-2), \
        float(jnp.max(jnp.abs(out2 - ref)))

    print("KERNEL_OK")
</pallas_src>

<mosaic_0001>
module attributes {stable_mosaic.version = 11 : i64} {
  func.func @_fused_shuffle_kernel(%arg0: i32, %arg1: i32, %arg2: memref<1x1x4x216xf32, #tpu.memory_space<vmem>>, %arg3: memref<16x36xbf16, #tpu.memory_space<vmem>>, %arg4: memref<16x1xf32, #tpu.memory_space<vmem>>, %arg5: memref<16x36xbf16, #tpu.memory_space<vmem>>, %arg6: memref<16x1xf32, #tpu.memory_space<vmem>>, %arg7: memref<2x160xbf16, #tpu.memory_space<vmem>>, %arg8: memref<1x64x128xf32, #tpu.memory_space<vmem>>, %arg9: memref<36x160xbf16, #tpu.memory_space<vmem>>, %arg10: memref<16x184xbf16, #tpu.memory_space<vmem>>) attributes {dimension_semantics = [#tpu.dimension_semantics<parallel>, #tpu.dimension_semantics<parallel>], iteration_bounds = array<i64: 2, 2>, scalar_prefetch = 0 : i64, scratch_operands = 2 : i64, tpu.core_type = #tpu.core_type<tc>, window_params = [{transform_indices = @transform_0, window_bounds = array<i64: 1, 1, 4, 216>}, {pipeline_mode = #tpu.pipeline_mode<synchronous>, transform_indices = @transform_1, window_bounds = array<i64: 16, 36>}, {pipeline_mode = #tpu.pipeline_mode<synchronous>, transform_indices = @transform_2, window_bounds = array<i64: 16, 1>}, {pipeline_mode = #tpu.pipeline_mode<synchronous>, transform_indices = @transform_3, window_bounds = array<i64: 16, 36>}, {pipeline_mode = #tpu.pipeline_mode<synchronous>, transform_indices = @transform_4, window_bounds = array<i64: 16, 1>}, {pipeline_mode = #tpu.pipeline_mode<synchronous>, transform_indices = @transform_5, window_bounds = array<i64: 2, 160>}, {transform_indices = @transform_6, window_bounds = array<i64: 1, 64, 128>}]} {
    %c0 = arith.constant 0 : index
    %c0_0 = arith.constant 0 : index
    %0 = vector.load %arg7[%c0, %c0_0] : memref<2x160xbf16, #tpu.memory_space<vmem>>, vector<1x160xbf16>
    %c1 = arith.constant 1 : index
    %c0_1 = arith.constant 0 : index
    %1 = vector.load %arg7[%c1, %c0_1] : memref<2x160xbf16, #tpu.memory_space<vmem>>, vector<1x160xbf16>
    %c0_2 = arith.constant 0 : index
    %c0_3 = arith.constant 0 : index
    %c0_4 = arith.constant 0 : index
    %c15 = arith.constant 15 : index
    %2 = vector.load %arg2[%c0_2, %c0_3, %c0_4, %c15] : memref<1x1x4x216xf32, #tpu.memory_space<vmem>>, vector<1x1x4x160xf32>
    %3 = vector.shape_cast %2 : vector<1x1x4x160xf32> to vector<4x160xf32>
    %4 = arith.extf %0 : vector<1x160xbf16> to vector<1x160xf32>
    %5 = vector.broadcast %4 : vector<1x160xf32> to vector<4x160xf32>
    %6 = arith.mulf %3, %5 : vector<4x160xf32>
    %7 = arith.truncf %6 : vector<4x160xf32> to vector<4x160xbf16>
    %c0_5 = arith.constant 0 : index
    %c0_6 = arith.constant 0 : index
    %8 = vector.load %arg9[%c0_5, %c0_6] : memref<36x160xbf16, #tpu.memory_space<vmem>>, vector<4x160xbf16>
    tpu.vector_store %arg9[%c0_5, %c0_6], %7 {strides = array<i32>} : memref<36x160xbf16, #tpu.memory_space<vmem>>, vector<4x160xbf16>,
    %c0_7 = arith.constant 0 : index
    %c0_8 = arith.constant 0 : index
    %c0_9 = arith.constant 0 : index
    %c16 = arith.constant 16 : index
    %9 = vector.load %arg2[%c0_7, %c0_8, %c0_9, %c16] : memref<1x1x4x216xf32, #tpu.memory_space<vmem>>, vector<1x1x4x160xf32>
    %10 = vector.shape_cast %9 : vector<1x1x4x160xf32> to vector<4x160xf32>
    %11 = arith.truncf %10 : vector<4x160xf32> to vector<4x160xbf16>
    %c4 = arith.constant 4 : index
    %c0_10 = arith.constant 0 : index
    %12 = vector.load %arg9[%c4, %c0_10] : memref<36x160xbf16, #tpu.memory_space<vmem>>, vector<4x160xbf16>
    tpu.vector_store %arg9[%c4, %c0_10], %11 {strides = array<i32>} : memref<36x160xbf16, #tpu.memory_space<vmem>>, vector<4x160xbf16>,
    %c0_11 = arith.constant 0 : index
    %c0_12 = arith.constant 0 : index
    %c0_13 = arith.constant 0 : index
    %c17 = arith.constant 17 : index
    %13 = vector.load %arg2[%c0_11, %c0_12, %c0_13, %c17] : memref<1x1x4x216xf32, #tpu.memory_space<vmem>>, vector<1x1x4x160xf32>
    %14 = vector.shape_cast %13 : vector<1x1x4x160xf32> to vector<4x160xf32>
    %15 = arith.extf %1 : vector<1x160xbf16> to vector<1x160xf32>
    %16 = vector.broadcast %15 : vector<1x160xf32> to vector<4x160xf32>
    %17 = arith.mulf %14, %16 : vector<4x160xf32>
    %18 = arith.truncf %17 : vector<4x160xf32> to vector<4x160xbf16>
    %c8 = arith.constant 8 : index
    %c0_14 = arith.constant 0 : index
    %19 = vector.load %arg9[%c8, %c0_14] : memref<36x160xbf16, #tpu.memory_space<vmem>>, vector<4x160xbf16>
    tpu.vector_store %arg9[%c8, %c0_14], %18 {strides = array<i32>} : memref<36x160xbf16, #tpu.memory_space<vmem>>, vector<4x160xbf16>,
    %c0_15 = arith.constant 0 : index
    %c0_16 = arith.constant 0 : index
    %c0_17 = arith.constant 0 : index
    %c31 = arith.constant 31 : index
    %20 = vector.load %arg2[%c0_15, %c0_16, %c0_17, %c31] : memref<1x1x4x216xf32, #tpu.memory_space<vmem>>, vector<1x1x4x160xf32>
    %21 = vector.shape_cast %20 : vector<1x1x4x160xf32> to vector<4x160xf32>
    %22 = arith.extf %0 : vector<1x160xbf16> to vector<1x160xf32>
    %23 = vector.broadcast %22 : vector<1x160xf32> to vector<4x160xf32>
    %24 = arith.mulf %21, %23 : vector<4x160xf32>
    %25 = arith.truncf %24 : vector<4x160xf32> to vector<4x160xbf16>
    %c12 = arith.constant 12 : index
    %c0_18 = arith.constant 0 : index
    %26 = vector.load %arg9[%c12, %c0_18] : memref<36x160xbf16, #tpu.memory_space<vmem>>, vector<4x160xbf16>
    tpu.vector_store %arg9[%c12, %c0_18], %25 {strides = array<i32>} : memref<36x160xbf16, #tpu.memory_space<vmem>>, vector<4x160xbf16>,
    %c0_19 = arith.constant 0 : index
    %c0_20 = arith.constant 0 : index
    %c0_21 = arith.constant 0 : index
    %c32 = arith.constant 32 : index
    %27 = vector.load %arg2[%c0_19, %c0_20, %c0_21, %c32] : memref<1x1x4x216xf32, #tpu.memory_space<vmem>>, vector<1x1x4x160xf32>
    %28 = vector.shape_cast %27 : vector<1x1x4x160xf32> to vector<4x160xf32>
    %29 = arith.truncf %28 : vector<4x160xf32> to vector<4x160xbf16>
    %c16_22 = arith.constant 16 : index
    %c0_23 = arith.constant 0 : index
    %30 = vector.load %arg9[%c16_22, %c0_23] : memref<36x160xbf16, #tpu.memory_space<vmem>>, vector<4x160xbf16>
    tpu.vector_store %arg9[%c16_22, %c0_23], %29 {strides = array<i32>} : memref<36x160xbf16, #tpu.memory_space<vmem>>, vector<4x160xbf16>,
    %c0_24 = arith.constant 0 : index
    %c0_25 = arith.constant 0 : index
    %c0_26 = arith.constant 0 : index
    %c33 = arith.constant 33 : index
    %31 = vector.load %arg2[%c0_24, %c0_25, %c0_26, %c33] : memref<1x1x4x216xf32, #tpu.memory_space<vmem>>, vector<1x1x4x160xf32>
    %32 = vector.shape_cast %31 : vector<1x1x4x160xf32> to vector<4x160xf32>
    %33 = arith.extf %1 : vector<1x160xbf16> to vector<1x160xf32>
    %34 = vector.broadcast %33 : vector<1x160xf32> to vector<4x160xf32>
    %35 = arith.mulf %32, %34 : vector<4x160xf32>
    %36 = arith.truncf %35 : vector<4x160xf32> to vector<4x160xbf16>
    %c20 = arith.constant 20 : index
    %c0_27 = arith.constant 0 : index
    %37 = vector.load %arg9[%c20, %c0_27] : memref<36x160xbf16, #tpu.memory_space<vmem>>, vector<4x160xbf16>
    tpu.vector_store %arg9[%c20, %c0_27], %36 {strides = array<i32>} : memref<36x160xbf16, #tpu.memory_space<vmem>>, vector<4x160xbf16>,
    %c0_28 = arith.constant 0 : index
    %c0_29 = arith.constant 0 : index
    %c0_30 = arith.constant 0 : index
    %c47 = arith.constant 47 : index
    %38 = vector.load %arg2[%c0_28, %c0_29, %c0_30, %c47] : memref<1x1x4x216xf32, #tpu.memory_space<vmem>>, vector<1x1x4x160xf32>
    %39 = vector.shape_cast %38 : vector<1x1x4x160xf32> to vector<4x160xf32>
    %40 = arith.extf %0 : vector<1x160xbf16> to vector<1x160xf32>
    %41 = vector.broadcast %40 : vector<1x160xf32> to vector<4x160xf32>
    %42 = arith.mulf %39, %41 : vector<4x160xf32>
    %43 = arith.truncf %42 : vector<4x160xf32> to vector<4x160xbf16>
    %c24 = arith.constant 24 : index
    %c0_31 = arith.constant 0 : index
    %44 = vector.load %arg9[%c24, %c0_31] : memref<36x160xbf16, #tpu.memory_space<vmem>>, vector<4x160xbf16>
    tpu.vector_store %arg9[%c24, %c0_31], %43 {strides = array<i32>} : memref<36x160xbf16, #tpu.memory_space<vmem>>, vector<4x160xbf16>,
    %c0_32 = arith.constant 0 : index
    %c0_33 = arith.constant 0 : index
    %c0_34 = arith.constant 0 : index
    %c48 = arith.constant 48 : index
    %45 = vector.load %arg2[%c0_32, %c0_33, %c0_34, %c48] : memref<1x1x4x216xf32, #tpu.memory_space<vmem>>, vector<1x1x4x160xf32>
    %46 = vector.shape_cast %45 : vector<1x1x4x160xf32> to vector<4x160xf32>
    %47 = arith.truncf %46 : vector<4x160xf32> to vector<4x160xbf16>
    %c28 = arith.constant 28 : index
    %c0_35 = arith.constant 0 : index
    %48 = vector.load %arg9[%c28, %c0_35] : memref<36x160xbf16, #tpu.memory_space<vmem>>, vector<4x160xbf16>
    tpu.vector_store %arg9[%c28, %c0_35], %47 {strides = array<i32>} : memref<36x160xbf16, #tpu.memory_space<vmem>>, vector<4x160xbf16>,
    %c0_36 = arith.constant 0 : index
    %c0_37 = arith.constant 0 : index
    %c0_38 = arith.constant 0 : index
    %c49 = arith.constant 49 : index
    %49 = vector.load %arg2[%c0_36, %c0_37, %c0_38, %c49] : memref<1x1x4x216xf32, #tpu.memory_space<vmem>>, vector<1x1x4x160xf32>
    %50 = vector.shape_cast %49 : vector<1x1x4x160xf32> to vector<4x160xf32>
    %51 = arith.extf %1 : vector<1x160xbf16> to vector<1x160xf32>
    %52 = vector.broadcast %51 : vector<1x160xf32> to vector<4x160xf32>
    %53 = arith.mulf %50, %52 : vector<4x160xf32>
    %54 = arith.truncf %53 : vector<4x160xf32> to vector<4x160xbf16>
    %c32_39 = arith.constant 32 : index
    %c0_40 = arith.constant 0 : index
    %55 = vector.load %arg9[%c32_39, %c0_40] : memref<36x160xbf16, #tpu.memory_space<vmem>>, vector<4x160xbf16>
    tpu.vector_store %arg9[%c32_39, %c0_40], %54 {strides = array<i32>} : memref<36x160xbf16, #tpu.memory_space<vmem>>, vector<4x160xbf16>,
    %c0_41 = arith.constant 0 : index
    %c0_42 = arith.constant 0 : index
    %56 = vector.load %arg3[%c0_41, %c0_42] : memref<16x36xbf16, #tpu.memory_space<vmem>>, vector<16x36xbf16>
    %c0_43 = arith.constant 0 : index
    %c0_44 = arith.constant 0 : index
    %57 = vector.load %arg9[%c0_43, %c0_44] : memref<36x160xbf16, #tpu.memory_space<vmem>>, vector<36x160xbf16>
    %cst = arith.constant dense<0.000000e+00> : vector<16x160xf32>
    %58 = tpu.matmul %56, %57, %cst {dimension_numbers = #tpu.dot_dimension_numbers<[1], [0], [0], [1], [0, 0, 1, 1], [], []>} : vector<16x36xbf16>, vector<36x160xbf16>, vector<16x160xf32> -> vector<16x160xf32>
    %c0_45 = arith.constant 0 : index
    %c0_46 = arith.constant 0 : index
    %59 = vector.load %arg4[%c0_45, %c0_46] : memref<16x1xf32, #tpu.memory_space<vmem>>, vector<16x1xf32>
    %60 = vector.broadcast %59 : vector<16x1xf32> to vector<16x160xf32>
    %61 = arith.addf %58, %60 : vector<16x160xf32>
    %62 = arith.truncf %61 : vector<16x160xf32> to vector<16x160xbf16>
    %c0_47 = arith.constant 0 : index
    %c16_48 = arith.constant 16 : index
    %63 = vector.load %arg10[%c0_47, %c16_48] : memref<16x184xbf16, #tpu.memory_space<vmem>>, vector<16x160xbf16>
    tpu.vector_store %arg10[%c0_47, %c16_48], %62 {strides = array<i32>} : memref<16x184xbf16, #tpu.memory_space<vmem>>, vector<16x160xbf16>,
    %cst_49 = arith.constant 0.000000e+00 : bf16
    %64 = vector.broadcast %cst_49 : bf16 to vector<16x1xbf16>
    %c0_50 = arith.constant 0 : index
    %c15_51 = arith.constant 15 : index
    %65 = vector.load %arg10[%c0_50, %c15_51] : memref<16x184xbf16, #tpu.memory_space<vmem>>, vector<16x1xbf16>
    tpu.vector_store %arg10[%c0_50, %c15_51], %64 {strides = array<i32>} : memref<16x184xbf16, #tpu.memory_space<vmem>>, vector<16x1xbf16>,
    %cst_52 = arith.constant 0.000000e+00 : bf16
    %66 = vector.broadcast %cst_52 : bf16 to vector<16x1xbf16>
    %c0_53 = arith.constant 0 : index
    %c176 = arith.constant 176 : index
    %67 = vector.load %arg10[%c0_53, %c176] : memref<16x184xbf16, #tpu.memory_space<vmem>>, vector<16x1xbf16>
    tpu.vector_store %arg10[%c0_53, %c176], %66 {strides = array<i32>} : memref<16x184xbf16, #tpu.memory_space<vmem>>, vector<16x1xbf16>,
    %c0_i32 = arith.constant 0 : i32
    %68 = arith.cmpi eq, %arg1, %c0_i32 : i32
    %69 = arith.extui %68 : i1 to i32
    %c0_i32_54 = arith.constant 0 : i32
    %70 = arith.cmpi ne, %69, %c0_i32_54 : i32
    scf.if %70 {
      %cst_244 = arith.constant 0.000000e+00 : bf16
      %208 = vector.broadcast %cst_244 : bf16 to vector<16x16xbf16>
      %c0_245 = arith.constant 0 : index
      %c16_246 = arith.constant 16 : index
      %209 = vector.load %arg10[%c0_245, %c16_246] : memref<16x184xbf16, #tpu.memory_space<vmem>>, vector<16x16xbf16>
      tpu.vector_store %arg10[%c0_245, %c16_246], %208 {strides = array<i32>} : memref<16x184xbf16, #tpu.memory_space<vmem>>, vector<16x16xbf16>,
    } else {
    }
    %c1_i32 = arith.constant 1 : i32
    %71 = arith.cmpi eq, %arg1, %c1_i32 : i32
    %72 = arith.extui %71 : i1 to i32
    %c0_i32_55 = arith.constant 0 : i32
    %73 = arith.cmpi ne, %72, %c0_i32_55 : i32
    scf.if %73 {
      %cst_244 = arith.constant 0.000000e+00 : bf16
      %208 = vector.broadcast %cst_244 : bf16 to vector<16x16xbf16>
      %c0_245 = arith.constant 0 : index
      %c160 = arith.constant 160 : index
      %209 = vector.load %arg10[%c0_245, %c160] : memref<16x184xbf16, #tpu.memory_space<vmem>>, vector<16x16xbf16>
      tpu.vector_store %arg10[%c0_245, %c160], %208 {strides = array<i32>} : memref<16x184xbf16, #tpu.memory_space<vmem>>, vector<16x16xbf16>,
    } else {
    }
    %c0_56 = arith.constant 0 : index
    %c0_57 = arith.constant 0 : index
    %74 = vector.load %arg7[%c0_56, %c0_57] : memref<2x160xbf16, #tpu.memory_space<vmem>>, vector<1x128xbf16>
    %c1_58 = arith.constant 1 : index
    %c0_59 = arith.constant 0 : index
    %75 = vector.load %arg7[%c1_58, %c0_59] : memref<2x160xbf16, #tpu.memory_space<vmem>>, vector<1x128xbf16>
    %c12_60 = arith.constant 12 : index
    %c15_61 = arith.constant 15 : index
    %76 = vector.load %arg10[%c12_60, %c15_61] : memref<16x184xbf16, #tpu.memory_space<vmem>>, vector<4x128xbf16>
    %77 = vector.broadcast %74 : vector<1x128xbf16> to vector<4x128xbf16>
    %78 = arith.mulf %76, %77 : vector<4x128xbf16>
    %c0_62 = arith.constant 0 : index
    %c0_63 = arith.constant 0 : index
    %79 = vector.load %arg9[%c0_62, %c0_63] : memref<36x160xbf16, #tpu.memory_space<vmem>>, vector<4x128xbf16>
    tpu.vector_store %arg9[%c0_62, %c0_63], %78 {strides = array<i32>} : memref<36x160xbf16, #tpu.memory_space<vmem>>, vector<4x128xbf16>,
    %c8_64 = arith.constant 8 : index
    %c16_65 = arith.constant 16 : index
    %80 = vector.load %arg10[%c8_64, %c16_65] : memref<16x184xbf16, #tpu.memory_space<vmem>>, vector<4x128xbf16>
    %c4_66 = arith.constant 4 : index
    %c0_67 = arith.constant 0 : index
    %81 = vector.load %arg9[%c4_66, %c0_67] : memref<36x160xbf16, #tpu.memory_space<vmem>>, vector<4x128xbf16>
    tpu.vector_store %arg9[%c4_66, %c0_67], %80 {strides = array<i32>} : memref<36x160xbf16, #tpu.memory_space<vmem>>, vector<4x128xbf16>,
    %c12_68 = arith.constant 12 : index
    %c16_69 = arith.constant 16 : index
    %82 = vector.load %arg10[%c12_68, %c16_69] : memref<16x184xbf16, #tpu.memory_space<vmem>>, vector<4x128xbf16>
    %c8_70 = arith.constant 8 : index
    %c0_71 = arith.constant 0 : index
    %83 = vector.load %arg9[%c8_70, %c0_71] : memref<36x160xbf16, #tpu.memory_space<vmem>>, vector<4x128xbf16>
    tpu.vector_store %arg9[%c8_70, %c0_71], %82 {strides = array<i32>} : memref<36x160xbf16, #tpu.memory_space<vmem>>, vector<4x128xbf16>,
    %c4_72 = arith.constant 4 : index
    %c31_73 = arith.constant 31 : index
    %84 = vector.load %arg10[%c4_72, %c31_73] : memref<16x184xbf16, #tpu.memory_space<vmem>>, vector<4x128xbf16>
    %85 = vector.broadcast %74 : vector<1x128xbf16> to vector<4x128xbf16>
    %86 = arith.mulf %84, %85 : vector<4x128xbf16>
    %c12_74 = arith.constant 12 : index
    %c0_75 = arith.constant 0 : index
    %87 = vector.load %arg9[%c12_74, %c0_75] : memref<36x160xbf16, #tpu.memory_space<vmem>>, vector<4x128xbf16>
    tpu.vector_store %arg9[%c12_74, %c0_75], %86 {strides = array<i32>} : memref<36x160xbf16, #tpu.memory_space<vmem>>, vector<4x128xbf16>,
    %c0_76 = arith.constant 0 : index
    %c32_77 = arith.constant 32 : index
    %88 = vector.load %arg10[%c0_76, %c32_77] : memref<16x184xbf16, #tpu.memory_space<vmem>>, vector<4x128xbf16>
    %c16_78 = arith.constant 16 : index
    %c0_79 = arith.constant 0 : index
    %89 = vector.load %arg9[%c16_78, %c0_79] : memref<36x160xbf16, #tpu.memory_space<vmem>>, vector<4x128xbf16>
    tpu.vector_store %arg9[%c16_78, %c0_79], %88 {strides = array<i32>} : memref<36x160xbf16, #tpu.memory_space<vmem>>, vector<4x128xbf16>,
    %c4_80 = arith.constant 4 : index
    %c32_81 = arith.constant 32 : index
    %90 = vector.load %arg10[%c4_80, %c32_81] : memref<16x184xbf16, #tpu.memory_space<vmem>>, vector<4x128xbf16>
    %c20_82 = arith.constant 20 : index
    %c0_83 = arith.constant 0 : index
    %91 = vector.load %arg9[%c20_82, %c0_83] : memref<36x160xbf16, #tpu.memory_space<vmem>>, vector<4x128xbf16>
    tpu.vector_store %arg9[%c20_82, %c0_83], %90 {strides = array<i32>} : memref<36x160xbf16, #tpu.memory_space<vmem>>, vector<4x128xbf16>,
    %c12_84 = arith.constant 12 : index
    %c31_85 = arith.constant 31 : index
    %92 = vector.load %arg10[%c12_84, %c31_85] : memref<16x184xbf16, #tpu.memory_space<vmem>>, vector<4x128xbf16>
    %93 = vector.broadcast %74 : vector<1x128xbf16> to vector<4x128xbf16>
    %94 = arith.mulf %92, %93 : vector<4x128xbf16>
    %c24_86 = arith.constant 24 : index
    %c0_87 = arith.constant 0 : index
    %95 = vector.load %arg9[%c24_86, %c0_87] : memref<36x160xbf16, #tpu.memory_space<vmem>>, vector<4x128xbf16>
    tpu.vector_store %arg9[%c24_86, %c0_87], %94 {strides = array<i32>} : memref<36x160xbf16, #tpu.memory_space<vmem>>, vector<4x128xbf16>,
    %c8_88 = arith.constant 8 : index
    %c32_89 = arith.constant 32 : index
    %96 = vector.load %arg10[%c8_88, %c32_89] : memref<16x184xbf16, #tpu.memory_space<vmem>>, vector<4x128xbf16>
    %c28_90 = arith.constant 28 : index
    %c0_91 = arith.constant 0 : index
    %97 = vector.load %arg9[%c28_90, %c0_91] : memref<36x160xbf16, #tpu.memory_space<vmem>>, vector<4x128xbf16>
    tpu.vector_store %arg9[%c28_90, %c0_91], %96 {strides = array<i32>} : memref<36x160xbf16, #tpu.memory_space<vmem>>, vector<4x128xbf16>,
    %c12_92 = arith.constant 12 : index
    %c32_93 = arith.constant 32 : index
    %98 = vector.load %arg10[%c12_92, %c32_93] : memref<16x184xbf16, #tpu.memory_space<vmem>>, vector<4x128xbf16>
    %c32_94 = arith.constant 32 : index
    %c0_95 = arith.constant 0 : index
    %99 = vector.load %arg9[%c32_94, %c0_95] : memref<36x160xbf16, #tpu.memory_space<vmem>>, vector<4x128xbf16>
    tpu.vector_store %arg9[%c32_94, %c0_95], %98 {strides = array<i32>} : memref<36x160xbf16, #tpu.memory_space<vmem>>, vector<4x128xbf16>,
    %c0_96 = arith.constant 0 : index
    %c0_97 = arith.constant 0 : index
    %100 = vector.load %arg5[%c0_96, %c0_97] : memref<16x36xbf16, #tpu.memory_space<vmem>>, vector<16x36xbf16>
    %c0_98 = arith.constant 0 : index
    %c0_99 = arith.constant 0 : index
    %101 = vector.load %arg9[%c0_98, %c0_99] : memref<36x160xbf16, #tpu.memory_space<vmem>>, vector<36x128xbf16>
    %cst_100 = arith.constant dense<0.000000e+00> : vector<16x128xf32>
    %102 = tpu.matmul %100, %101, %cst_100 {dimension_numbers = #tpu.dot_dimension_numbers<[1], [0], [0], [1], [0, 0, 1, 1], [], []>} : vector<16x36xbf16>, vector<36x128xbf16>, vector<16x128xf32> -> vector<16x128xf32>
    %c0_101 = arith.constant 0 : index
    %c0_102 = arith.constant 0 : index
    %103 = vector.load %arg6[%c0_101, %c0_102] : memref<16x1xf32, #tpu.memory_space<vmem>>, vector<16x1xf32>
    %104 = vector.broadcast %103 : vector<16x1xf32> to vector<16x128xf32>
    %105 = arith.addf %102, %104 : vector<16x128xf32>
    %c0_103 = arith.constant 0 : index
    %c0_104 = arith.constant 0 : index
    %c0_105 = arith.constant 0 : index
    %106 = vector.load %arg8[%c0_103, %c0_104, %c0_105] : memref<1x64x128xf32, #tpu.memory_space<vmem>>, vector<1x16x128xf32>
    %107 = vector.shape_cast %106 : vector<1x16x128xf32> to vector<16x128xf32>
    %108 = vector.shape_cast %105 : vector<16x128xf32> to vector<1x16x128xf32>
    tpu.vector_store %arg8[%c0_103, %c0_104, %c0_105], %108 {strides = array<i32>} : memref<1x64x128xf32, #tpu.memory_space<vmem>>, vector<1x16x128xf32>,
    %c8_106 = arith.constant 8 : index
    %c16_107 = arith.constant 16 : index
    %109 = vector.load %arg10[%c8_106, %c16_107] : memref<16x184xbf16, #tpu.memory_space<vmem>>, vector<4x128xbf16>
    %c0_108 = arith.constant 0 : index
    %c0_109 = arith.constant 0 : index
    %110 = vector.load %arg9[%c0_108, %c0_109] : memref<36x160xbf16, #tpu.memory_space<vmem>>, vector<4x128xbf16>
    tpu.vector_store %arg9[%c0_108, %c0_109], %109 {strides = array<i32>} : memref<36x160xbf16, #tpu.memory_space<vmem>>, vector<4x128xbf16>,
    %c12_110 = arith.constant 12 : index
    %c16_111 = arith.constant 16 : index
    %111 = vector.load %arg10[%c12_110, %c16_111] : memref<16x184xbf16, #tpu.memory_space<vmem>>, vector<4x128xbf16>
    %c4_112 = arith.constant 4 : index
    %c0_113 = arith.constant 0 : index
    %112 = vector.load %arg9[%c4_112, %c0_113] : memref<36x160xbf16, #tpu.memory_space<vmem>>, vector<4x128xbf16>
    tpu.vector_store %arg9[%c4_112, %c0_113], %111 {strides = array<i32>} : memref<36x160xbf16, #tpu.memory_space<vmem>>, vector<4x128xbf16>,
    %c8_114 = arith.constant 8 : index
    %c17_115 = arith.constant 17 : index
    %113 = vector.load %arg10[%c8_114, %c17_115] : memref<16x184xbf16, #tpu.memory_space<vmem>>, vector<4x128xbf16>
    %114 = vector.broadcast %75 : vector<1x128xbf16> to vector<4x128xbf16>
    %115 = arith.mulf %113, %114 : vector<4x128xbf16>
    %c8_116 = arith.constant 8 : index
    %c0_117 = arith.constant 0 : index
    %116 = vector.load %arg9[%c8_116, %c0_117] : memref<36x160xbf16, #tpu.memory_space<vmem>>, vector<4x128xbf16>
    tpu.vector_store %arg9[%c8_116, %c0_117], %115 {strides = array<i32>} : memref<36x160xbf16, #tpu.memory_space<vmem>>, vector<4x128xbf16>,
    %c0_118 = arith.constant 0 : index
    %c32_119 = arith.constant 32 : index
    %117 = vector.load %arg10[%c0_118, %c32_119] : memref<16x184xbf16, #tpu.memory_space<vmem>>, vector<4x128xbf16>
    %c12_120 = arith.constant 12 : index
    %c0_121 = arith.constant 0 : index
    %118 = vector.load %arg9[%c12_120, %c0_121] : memref<36x160xbf16, #tpu.memory_space<vmem>>, vector<4x128xbf16>
    tpu.vector_store %arg9[%c12_120, %c0_121], %117 {strides = array<i32>} : memref<36x160xbf16, #tpu.memory_space<vmem>>, vector<4x128xbf16>,
    %c4_122 = arith.constant 4 : index
    %c32_123 = arith.constant 32 : index
    %119 = vector.load %arg10[%c4_122, %c32_123] : memref<16x184xbf16, #tpu.memory_space<vmem>>, vector<4x128xbf16>
    %c16_124 = arith.constant 16 : index
    %c0_125 = arith.constant 0 : index
    %120 = vector.load %arg9[%c16_124, %c0_125] : memref<36x160xbf16, #tpu.memory_space<vmem>>, vector<4x128xbf16>
    tpu.vector_store %arg9[%c16_124, %c0_125], %119 {strides = array<i32>} : memref<36x160xbf16, #tpu.memory_space<vmem>>, vector<4x128xbf16>,
    %c0_126 = arith.constant 0 : index
    %c33_127 = arith.constant 33 : index
    %121 = vector.load %arg10[%c0_126, %c33_127] : memref<16x184xbf16, #tpu.memory_space<vmem>>, vector<4x128xbf16>
    %122 = vector.broadcast %75 : vector<1x128xbf16> to vector<4x128xbf16>
    %123 = arith.mulf %121, %122 : vector<4x128xbf16>
    %c20_128 = arith.constant 20 : index
    %c0_129 = arith.constant 0 : index
    %124 = vector.load %arg9[%c20_128, %c0_129] : memref<36x160xbf16, #tpu.memory_space<vmem>>, vector<4x128xbf16>
    tpu.vector_store %arg9[%c20_128, %c0_129], %123 {strides = array<i32>} : memref<36x160xbf16, #tpu.memory_space<vmem>>, vector<4x128xbf16>,
    %c8_130 = arith.constant 8 : index
    %c32_131 = arith.constant 32 : index
    %125 = vector.load %arg10[%c8_130, %c32_131] : memref<16x184xbf16, #tpu.memory_space<vmem>>, vector<4x128xbf16>
    %c24_132 = arith.constant 24 : index
    %c0_133 = arith.constant 0 : index
    %126 = vector.load %arg9[%c24_132, %c0_133] : memref<36x160xbf16, #tpu.memory_space<vmem>>, vector<4x128xbf16>
    tpu.vector_store %arg9[%c24_132, %c0_133], %125 {strides = array<i32>} : memref<36x160xbf16, #tpu.memory_space<vmem>>, vector<4x128xbf16>,
    %c12_134 = arith.constant 12 : index
    %c32_135 = arith.constant 32 : index
    %127 = vector.load %arg10[%c12_134, %c32_135] : memref<16x184xbf16, #tpu.memory_space<vmem>>, vector<4x128xbf16>
    %c28_136 = arith.constant 28 : index
    %c0_137 = arith.constant 0 : index
    %128 = vector.load %arg9[%c28_136, %c0_137] : memref<36x160xbf16, #tpu.memory_space<vmem>>, vector<4x128xbf16>
    tpu.vector_store %arg9[%c28_136, %c0_137], %127 {strides = array<i32>} : memref<36x160xbf16, #tpu.memory_space<vmem>>, vector<4x128xbf16>,
    %c8_138 = arith.constant 8 : index
    %c33_139 = arith.constant 33 : index
    %129 = vector.load %arg10[%c8_138, %c33_139] : memref<16x184xbf16, #tpu.memory_space<vmem>>, vector<4x128xbf16>
    %130 = vector.broadcast %75 : vector<1x128xbf16> to vector<4x128xbf16>
    %131 = arith.mulf %129, %130 : vector<4x128xbf16>
    %c32_140 = arith.constant 32 : index
    %c0_141 = arith.constant 0 : index
    %132 = vector.load %arg9[%c32_140, %c0_141] : memref<36x160xbf16, #tpu.memory_space<vmem>>, vector<4x128xbf16>
    tpu.vector_store %arg9[%c32_140, %c0_141], %131 {strides = array<i32>} : memref<36x160xbf16, #tpu.memory_space<vmem>>, vector<4x128xbf16>,
    %c0_142 = arith.constant 0 : index
    %c0_143 = arith.constant 0 : index
    %133 = vector.load %arg5[%c0_142, %c0_143] : memref<16x36xbf16, #tpu.memory_space<vmem>>, vector<16x36xbf16>
    %c0_144 = arith.constant 0 : index
    %c0_145 = arith.constant 0 : index
    %134 = vector.load %arg9[%c0_144, %c0_145] : memref<36x160xbf16, #tpu.memory_space<vmem>>, vector<36x128xbf16>
    %cst_146 = arith.constant dense<0.000000e+00> : vector<16x128xf32>
    %135 = tpu.matmul %133, %134, %cst_146 {dimension_numbers = #tpu.dot_dimension_numbers<[1], [0], [0], [1], [0, 0, 1, 1], [], []>} : vector<16x36xbf16>, vector<36x128xbf16>, vector<16x128xf32> -> vector<16x128xf32>
    %c0_147 = arith.constant 0 : index
    %c0_148 = arith.constant 0 : index
    %136 = vector.load %arg6[%c0_147, %c0_148] : memref<16x1xf32, #tpu.memory_space<vmem>>, vector<16x1xf32>
    %137 = vector.broadcast %136 : vector<16x1xf32> to vector<16x128xf32>
    %138 = arith.addf %135, %137 : vector<16x128xf32>
    %c0_149 = arith.constant 0 : index
    %c16_150 = arith.constant 16 : index
    %c0_151 = arith.constant 0 : index
    %139 = vector.load %arg8[%c0_149, %c16_150, %c0_151] : memref<1x64x128xf32, #tpu.memory_space<vmem>>, vector<1x16x128xf32>
    %140 = vector.shape_cast %139 : vector<1x16x128xf32> to vector<16x128xf32>
    %141 = vector.shape_cast %138 : vector<16x128xf32> to vector<1x16x128xf32>
    tpu.vector_store %arg8[%c0_149, %c16_150, %c0_151], %141 {strides = array<i32>} : memref<1x64x128xf32, #tpu.memory_space<vmem>>, vector<1x16x128xf32>,
    %c4_152 = arith.constant 4 : index
    %c31_153 = arith.constant 31 : index
    %142 = vector.load %arg10[%c4_152, %c31_153] : memref<16x184xbf16, #tpu.memory_space<vmem>>, vector<4x128xbf16>
    %143 = vector.broadcast %74 : vector<1x128xbf16> to vector<4x128xbf16>
    %144 = arith.mulf %142, %143 : vector<4x128xbf16>
    %c0_154 = arith.constant 0 : index
    %c0_155 = arith.constant 0 : index
    %145 = vector.load %arg9[%c0_154, %c0_155] : memref<36x160xbf16, #tpu.memory_space<vmem>>, vector<4x128xbf16>
    tpu.vector_store %arg9[%c0_154, %c0_155], %144 {strides = array<i32>} : memref<36x160xbf16, #tpu.memory_space<vmem>>, vector<4x128xbf16>,
    %c0_156 = arith.constant 0 : index
    %c32_157 = arith.constant 32 : index
    %146 = vector.load %arg10[%c0_156, %c32_157] : memref<16x184xbf16, #tpu.memory_space<vmem>>, vector<4x128xbf16>
    %c4_158 = arith.constant 4 : index
    %c0_159 = arith.constant 0 : index
    %147 = vector.load %arg9[%c4_158, %c0_159] : memref<36x160xbf16, #tpu.memory_space<vmem>>, vector<4x128xbf16>
    tpu.vector_store %arg9[%c4_158, %c0_159], %146 {strides = array<i32>} : memref<36x160xbf16, #tpu.memory_space<vmem>>, vector<4x128xbf16>,
    %c4_160 = arith.constant 4 : index
    %c32_161 = arith.constant 32 : index
    %148 = vector.load %arg10[%c4_160, %c32_161] : memref<16x184xbf16, #tpu.memory_space<vmem>>, vector<4x128xbf16>
    %c8_162 = arith.constant 8 : index
    %c0_163 = arith.constant 0 : index
    %149 = vector.load %arg9[%c8_162, %c0_163] : memref<36x160xbf16, #tpu.memory_space<vmem>>, vector<4x128xbf16>
    tpu.vector_store %arg9[%c8_162, %c0_163], %148 {strides = array<i32>} : memref<36x160xbf16, #tpu.memory_space<vmem>>, vector<4x128xbf16>,
    %c12_164 = arith.constant 12 : index
    %c31_165 = arith.constant 31 : index
    %150 = vector.load %arg10[%c12_164, %c31_165] : memref<16x184xbf16, #tpu.memory_space<vmem>>, vector<4x128xbf16>
    %151 = vector.broadcast %74 : vector<1x128xbf16> to vector<4x128xbf16>
    %152 = arith.mulf %150, %151 : vector<4x128xbf16>
    %c12_166 = arith.constant 12 : index
    %c0_167 = arith.constant 0 : index
    %153 = vector.load %arg9[%c12_166, %c0_167] : memref<36x160xbf16, #tpu.memory_space<vmem>>, vector<4x128xbf16>
    tpu.vector_store %arg9[%c12_166, %c0_167], %152 {strides = array<i32>} : memref<36x160xbf16, #tpu.memory_space<vmem>>, vector<4x128xbf16>,
    %c8_168 = arith.constant 8 : index
    %c32_169 = arith.constant 32 : index
    %154 = vector.load %arg10[%c8_168, %c32_169] : memref<16x184xbf16, #tpu.memory_space<vmem>>, vector<4x128xbf16>
    %c16_170 = arith.constant 16 : index
    %c0_171 = arith.constant 0 : index
    %155 = vector.load %arg9[%c16_170, %c0_171] : memref<36x160xbf16, #tpu.memory_space<vmem>>, vector<4x128xbf16>
    tpu.vector_store %arg9[%c16_170, %c0_171], %154 {strides = array<i32>} : memref<36x160xbf16, #tpu.memory_space<vmem>>, vector<4x128xbf16>,
    %c12_172 = arith.constant 12 : index
    %c32_173 = arith.constant 32 : index
    %156 = vector.load %arg10[%c12_172, %c32_173] : memref<16x184xbf16, #tpu.memory_space<vmem>>, vector<4x128xbf16>
    %c20_174 = arith.constant 20 : index
    %c0_175 = arith.constant 0 : index
    %157 = vector.load %arg9[%c20_174, %c0_175] : memref<36x160xbf16, #tpu.memory_space<vmem>>, vector<4x128xbf16>
    tpu.vector_store %arg9[%c20_174, %c0_175], %156 {strides = array<i32>} : memref<36x160xbf16, #tpu.memory_space<vmem>>, vector<4x128xbf16>,
    %c4_176 = arith.constant 4 : index
    %c47_177 = arith.constant 47 : index
    %158 = vector.load %arg10[%c4_176, %c47_177] : memref<16x184xbf16, #tpu.memory_space<vmem>>, vector<4x128xbf16>
    %159 = vector.broadcast %74 : vector<1x128xbf16> to vector<4x128xbf16>
    %160 = arith.mulf %158, %159 : vector<4x128xbf16>
    %c24_178 = arith.constant 24 : index
    %c0_179 = arith.constant 0 : index
    %161 = vector.load %arg9[%c24_178, %c0_179] : memref<36x160xbf16, #tpu.memory_space<vmem>>, vector<4x128xbf16>
    tpu.vector_store %arg9[%c24_178, %c0_179], %160 {strides = array<i32>} : memref<36x160xbf16, #tpu.memory_space<vmem>>, vector<4x128xbf16>,
    %c0_180 = arith.constant 0 : index
    %c48_181 = arith.constant 48 : index
    %162 = vector.load %arg10[%c0_180, %c48_181] : memref<16x184xbf16, #tpu.memory_space<vmem>>, vector<4x128xbf16>
    %c28_182 = arith.constant 28 : index
    %c0_183 = arith.constant 0 : index
    %163 = vector.load %arg9[%c28_182, %c0_183] : memref<36x160xbf16, #tpu.memory_space<vmem>>, vector<4x128xbf16>
    tpu.vector_store %arg9[%c28_182, %c0_183], %162 {strides = array<i32>} : memref<36x160xbf16, #tpu.memory_space<vmem>>, vector<4x128xbf16>,
    %c4_184 = arith.constant 4 : index
    %c48_185 = arith.constant 48 : index
    %164 = vector.load %arg10[%c4_184, %c48_185] : memref<16x184xbf16, #tpu.memory_space<vmem>>, vector<4x128xbf16>
    %c32_186 = arith.constant 32 : index
    %c0_187 = arith.constant 0 : index
    %165 = vector.load %arg9[%c32_186, %c0_187] : memref<36x160xbf16, #tpu.memory_space<vmem>>, vector<4x128xbf16>
    tpu.vector_store %arg9[%c32_186, %c0_187], %164 {strides = array<i32>} : memref<36x160xbf16, #tpu.memory_space<vmem>>, vector<4x128xbf16>,
    %c0_188 = arith.constant 0 : index
    %c0_189 = arith.constant 0 : index
    %166 = vector.load %arg5[%c0_188, %c0_189] : memref<16x36xbf16, #tpu.memory_space<vmem>>, vector<16x36xbf16>
    %c0_190 = arith.constant 0 : index
    %c0_191 = arith.constant 0 : index
    %167 = vector.load %arg9[%c0_190, %c0_191] : memref<36x160xbf16, #tpu.memory_space<vmem>>, vector<36x128xbf16>
    %cst_192 = arith.constant dense<0.000000e+00> : vector<16x128xf32>
    %168 = tpu.matmul %166, %167, %cst_192 {dimension_numbers = #tpu.dot_dimension_numbers<[1], [0], [0], [1], [0, 0, 1, 1], [], []>} : vector<16x36xbf16>, vector<36x128xbf16>, vector<16x128xf32> -> vector<16x128xf32>
    %c0_193 = arith.constant 0 : index
    %c0_194 = arith.constant 0 : index
    %169 = vector.load %arg6[%c0_193, %c0_194] : memref<16x1xf32, #tpu.memory_space<vmem>>, vector<16x1xf32>
    %170 = vector.broadcast %169 : vector<16x1xf32> to vector<16x128xf32>
    %171 = arith.addf %168, %170 : vector<16x128xf32>
    %c0_195 = arith.constant 0 : index
    %c32_196 = arith.constant 32 : index
    %c0_197 = arith.constant 0 : index
    %172 = vector.load %arg8[%c0_195, %c32_196, %c0_197] : memref<1x64x128xf32, #tpu.memory_space<vmem>>, vector<1x16x128xf32>
    %173 = vector.shape_cast %172 : vector<1x16x128xf32> to vector<16x128xf32>
    %174 = vector.shape_cast %171 : vector<16x128xf32> to vector<1x16x128xf32>
    tpu.vector_store %arg8[%c0_195, %c32_196, %c0_197], %174 {strides = array<i32>} : memref<1x64x128xf32, #tpu.memory_space<vmem>>, vector<1x16x128xf32>,
    %c0_198 = arith.constant 0 : index
    %c32_199 = arith.constant 32 : index
    %175 = vector.load %arg10[%c0_198, %c32_199] : memref<16x184xbf16, #tpu.memory_space<vmem>>, vector<4x128xbf16>
    %c0_200 = arith.constant 0 : index
    %c0_201 = arith.constant 0 : index
    %176 = vector.load %arg9[%c0_200, %c0_201] : memref<36x160xbf16, #tpu.memory_space<vmem>>, vector<4x128xbf16>
    tpu.vector_store %arg9[%c0_200, %c0_201], %175 {strides = array<i32>} : memref<36x160xbf16, #tpu.memory_space<vmem>>, vector<4x128xbf16>,
    %c4_202 = arith.constant 4 : index
    %c32_203 = arith.constant 32 : index
    %177 = vector.load %arg10[%c4_202, %c32_203] : memref<16x184xbf16, #tpu.memory_space<vmem>>, vector<4x128xbf16>
    %c4_204 = arith.constant 4 : index
    %c0_205 = arith.constant 0 : index
    %178 = vector.load %arg9[%c4_204, %c0_205] : memref<36x160xbf16, #tpu.memory_space<vmem>>, vector<4x128xbf16>
    tpu.vector_store %arg9[%c4_204, %c0_205], %177 {strides = array<i32>} : memref<36x160xbf16, #tpu.memory_space<vmem>>, vector<4x128xbf16>,
    %c0_206 = arith.constant 0 : index
    %c33_207 = arith.constant 33 : index
    %179 = vector.load %arg10[%c0_206, %c33_207] : memref<16x184xbf16, #tpu.memory_space<vmem>>, vector<4x128xbf16>
    %180 = vector.broadcast %75 : vector<1x128xbf16> to vector<4x128xbf16>
    %181 = arith.mulf %179, %180 : vector<4x128xbf16>
    %c8_208 = arith.constant 8 : index
    %c0_209 = arith.constant 0 : index
    %182 = vector.load %arg9[%c8_208, %c0_209] : memref<36x160xbf16, #tpu.memory_space<vmem>>, vector<4x128xbf16>
    tpu.vector_store %arg9[%c8_208, %c0_209], %181 {strides = array<i32>} : memref<36x160xbf16, #tpu.memory_space<vmem>>, vector<4x128xbf16>,
    %c8_210 = arith.constant 8 : index
    %c32_211 = arith.constant 32 : index
    %183 = vector.load %arg10[%c8_210, %c32_211] : memref<16x184xbf16, #tpu.memory_space<vmem>>, vector<4x128xbf16>
    %c12_212 = arith.constant 12 : index
    %c0_213 = arith.constant 0 : index
    %184 = vector.load %arg9[%c12_212, %c0_213] : memref<36x160xbf16, #tpu.memory_space<vmem>>, vector<4x128xbf16>
    tpu.vector_store %arg9[%c12_212, %c0_213], %183 {strides = array<i32>} : memref<36x160xbf16, #tpu.memory_space<vmem>>, vector<4x128xbf16>,
    %c12_214 = arith.constant 12 : index
    %c32_215 = arith.constant 32 : index
    %185 = vector.load %arg10[%c12_214, %c32_215] : memref<16x184xbf16, #tpu.memory_space<vmem>>, vector<4x128xbf16>
    %c16_216 = arith.constant 16 : index
    %c0_217 = arith.constant 0 : index
    %186 = vector.load %arg9[%c16_216, %c0_217] : memref<36x160xbf16, #tpu.memory_space<vmem>>, vector<4x128xbf16>
    tpu.vector_store %arg9[%c16_216, %c0_217], %185 {strides = array<i32>} : memref<36x160xbf16, #tpu.memory_space<vmem>>, vector<4x128xbf16>,
    %c8_218 = arith.constant 8 : index
    %c33_219 = arith.constant 33 : index
    %187 = vector.load %arg10[%c8_218, %c33_219] : memref<16x184xbf16, #tpu.memory_space<vmem>>, vector<4x128xbf16>
    %188 = vector.broadcast %75 : vector<1x128xbf16> to vector<4x128xbf16>
    %189 = arith.mulf %187, %188 : vector<4x128xbf16>
    %c20_220 = arith.constant 20 : index
    %c0_221 = arith.constant 0 : index
    %190 = vector.load %arg9[%c20_220, %c0_221] : memref<36x160xbf16, #tpu.memory_space<vmem>>, vector<4x128xbf16>
    tpu.vector_store %arg9[%c20_220, %c0_221], %189 {strides = array<i32>} : memref<36x160xbf16, #tpu.memory_space<vmem>>, vector<4x128xbf16>,
    %c0_222 = arith.constant 0 : index
    %c48_223 = arith.constant 48 : index
    %191 = vector.load %arg10[%c0_222, %c48_223] : memref<16x184xbf16, #tpu.memory_space<vmem>>, vector<4x128xbf16>
    %c24_224 = arith.constant 24 : index
    %c0_225 = arith.constant 0 : index
    %192 = vector.load %arg9[%c24_224, %c0_225] : memref<36x160xbf16, #tpu.memory_space<vmem>>, vector<4x128xbf16>
    tpu.vector_store %arg9[%c24_224, %c0_225], %191 {strides = array<i32>} : memref<36x160xbf16, #tpu.memory_space<vmem>>, vector<4x128xbf16>,
    %c4_226 = arith.constant 4 : index
    %c48_227 = arith.constant 48 : index
    %193 = vector.load %arg10[%c4_226, %c48_227] : memref<16x184xbf16, #tpu.memory_space<vmem>>, vector<4x128xbf16>
    %c28_228 = arith.constant 28 : index
    %c0_229 = arith.constant 0 : index
    %194 = vector.load %arg9[%c28_228, %c0_229] : memref<36x160xbf16, #tpu.memory_space<vmem>>, vector<4x128xbf16>
    tpu.vector_store %arg9[%c28_228, %c0_229], %193 {strides = array<i32>} : memref<36x160xbf16, #tpu.memory_space<vmem>>, vector<4x128xbf16>,
    %c0_230 = arith.constant 0 : index
    %c49_231 = arith.constant 49 : index
    %195 = vector.load %arg10[%c0_230, %c49_231] : memref<16x184xbf16, #tpu.memory_space<vmem>>, vector<4x128xbf16>
    %196 = vector.broadcast %75 : vector<1x128xbf16> to vector<4x128xbf16>
    %197 = arith.mulf %195, %196 : vector<4x128xbf16>
    %c32_232 = arith.constant 32 : index
    %c0_233 = arith.constant 0 : index
    %198 = vector.load %arg9[%c32_232, %c0_233] : memref<36x160xbf16, #tpu.memory_space<vmem>>, vector<4x128xbf16>
    tpu.vector_store %arg9[%c32_232, %c0_233], %197 {strides = array<i32>} : memref<36x160xbf16, #tpu.memory_space<vmem>>, vector<4x128xbf16>,
    %c0_234 = arith.constant 0 : index
    %c0_235 = arith.constant 0 : index
    %199 = vector.load %arg5[%c0_234, %c0_235] : memref<16x36xbf16, #tpu.memory_space<vmem>>, vector<16x36xbf16>
    %c0_236 = arith.constant 0 : index
    %c0_237 = arith.constant 0 : index
    %200 = vector.load %arg9[%c0_236, %c0_237] : memref<36x160xbf16, #tpu.memory_space<vmem>>, vector<36x128xbf16>
    %cst_238 = arith.constant dense<0.000000e+00> : vector<16x128xf32>
    %201 = tpu.matmul %199, %200, %cst_238 {dimension_numbers = #tpu.dot_dimension_numbers<[1], [0], [0], [1], [0, 0, 1, 1], [], []>} : vector<16x36xbf16>, vector<36x128xbf16>, vector<16x128xf32> -> vector<16x128xf32>
    %c0_239 = arith.constant 0 : index
    %c0_240 = arith.constant 0 : index
    %202 = vector.load %arg6[%c0_239, %c0_240] : memref<16x1xf32, #tpu.memory_space<vmem>>, vector<16x1xf32>
    %203 = vector.broadcast %202 : vector<16x1xf32> to vector<16x128xf32>
    %204 = arith.addf %201, %203 : vector<16x128xf32>
    %c0_241 = arith.constant 0 : index
    %c48_242 = arith.constant 48 : index
    %c0_243 = arith.constant 0 : index
    %205 = vector.load %arg8[%c0_241, %c48_242, %c0_243] : memref<1x64x128xf32, #tpu.memory_space<vmem>>, vector<1x16x128xf32>
    %206 = vector.shape_cast %205 : vector<1x16x128xf32> to vector<16x128xf32>
    %207 = vector.shape_cast %204 : vector<16x128xf32> to vector<1x16x128xf32>
    tpu.vector_store %arg8[%c0_241, %c48_242, %c0_243], %207 {strides = array<i32>} : memref<1x64x128xf32, #tpu.memory_space<vmem>>, vector<1x16x128xf32>,
    return
  }
  func.func @transform_0(%arg0: i32, %arg1: i32) -> (i32, i32, i32, i32) {
    %c0_i32 = arith.constant 0 : i32
    %c0_i32_0 = arith.constant 0 : i32
    %c0_i32_1 = arith.constant 0 : i32
    return %arg0, %arg1, %c0_i32, %c0_i32_0 : i32, i32, i32, i32
  }
  func.func @transform_1(%arg0: i32, %arg1: i32) -> (i32, i32) {
    %c0_i32 = arith.constant 0 : i32
    %c0_i32_0 = arith.constant 0 : i32
    %c0_i32_1 = arith.constant 0 : i32
    return %c0_i32, %c0_i32_0 : i32, i32
  }
  func.func @transform_2(%arg0: i32, %arg1: i32) -> (i32, i32) {
    %c0_i32 = arith.constant 0 : i32
    %c0_i32_0 = arith.constant 0 : i32
    %c0_i32_1 = arith.constant 0 : i32
    return %c0_i32, %c0_i32_0 : i32, i32
  }
  func.func @transform_3(%arg0: i32, %arg1: i32) -> (i32, i32) {
    %c0_i32 = arith.constant 0 : i32
    %c0_i32_0 = arith.constant 0 : i32
    %c0_i32_1 = arith.constant 0 : i32
    return %c0_i32, %c0_i32_0 : i32, i32
  }
  func.func @transform_4(%arg0: i32, %arg1: i32) -> (i32, i32) {
    %c0_i32 = arith.constant 0 : i32
    %c0_i32_0 = arith.constant 0 : i32
    %c0_i32_1 = arith.constant 0 : i32
    return %c0_i32, %c0_i32_0 : i32, i32
  }
  func.func @transform_5(%arg0: i32, %arg1: i32) -> (i32, i32) {
    %c0_i32 = arith.constant 0 : i32
    %c0_i32_0 = arith.constant 0 : i32
    %c0_i32_1 = arith.constant 0 : i32
    return %c0_i32, %c0_i32_0 : i32, i32
  }
  func.func @transform_6(%arg0: i32, %arg1: i32) -> (i32, i32, i32) {
    %c0_i32 = arith.constant 0 : i32
    %c0_i32_0 = arith.constant 0 : i32
    return %arg0, %c0_i32, %arg1 : i32, i32, i32
  }
}

</mosaic_0001>

<bundles_post_ra>
// kernel: shuffle_forward.1
= control target key start
LH: loop header
LB: loop body
LE: loop exit
PB: predicated region body
PF: predicated region fallthrough
CT: control target
= control target key end

     0   :  { %s1912_s21 = smov 0   ;;  %s1914_s22 = smov 0   ;;  %s2303_s0 = inlined_call_operand.vmem [shape: f32[2,2,4,216], index: 0, kind: input, shape index: {}]   ;;  %s2304_s1 = inlined_call_operand.vmem [shape: bf16[16,36], index: 1, kind: input, shape index: {}]   ;;  %s2305_s2 = inlined_call_operand.vmem [shape: f32[16,1], index: 2, kind: input, shape index: {}]   ;;  %s2306_s3 = inlined_call_operand.vmem [shape: bf16[16,36], index: 3, kind: input, shape index: {}]   ;;  %s2307_s4 = inlined_call_operand.vmem [shape: f32[16,1], index: 4, kind: input, shape index: {}]   ;;  %s2308_s5 = inlined_call_operand.vmem [shape: bf16[2,160], index: 5, kind: input, shape index: {}]   ;;  %s2309_s6 = inlined_call_operand.vmem [shape: f32[2,64,256], index: 6, kind: output, shape index: {}]  }
   0x1   :  { %s1916_s23 = smov 0   ;;  %s1918_s24 = smov 0  }
   0x2   :  { %s1920_s25 = smov 0   ;;  %s1922_s26 = smov 0  }
   0x3   :  { %s1924_s27 = smov 0  }
   0x4 LB: > { %s25_s28 = sadd.s32 1, %s1846_s25  ;;  %s28_s29 = sadd.s32 1, %s1850_s26  ;;  %s1854_s27 = sphi %s1924_s27, %s16_s27   ;;  %s1850_s26 = sphi %s1922_s26, %s2358_s26   ;;  %s1846_s25 = sphi %s1920_s25, %s2357_s25   ;;  %s1842_s24 = sphi %s1918_s24, %s2356_s24   ;;  %s1838_s23 = sphi %s1916_s23, %s2355_s23   ;;  %s1834_s22 = sphi %s1914_s22, %s2354_s22   ;;  %s1830_s21 = sphi %s1912_s21, %s2353_s21  }
   0x5   : > { %p26_p0 = scmp.ge.s32.totalorder %s25_s28, 2  ;;  %s1564_s30 = sadd.s32 4294967295, %s1854_s27  }
   0x6   : > { %p180_p1 = scmp.ne.s32.totalorder %s1834_s22, %s1830_s21  ;;  %p181_p2 = scmp.eq.s32.totalorder %s1564_s30, 3 }
   0x7   : > { %s2360_s28 = smov (%p26_p0, %s25_s28), 0  ;;  %s2362_s29 = smov (!%p26_p0, %s28_s29), %s1850_s26 }
   0x8   : > { %s166_s7 = ssub.s32 %s1846_s25, %s2360_s28  ;;  %p30_p3 = scmp.ge.s32.totalorder %s2362_s29, 2 }
   0x9   : > { %p1568_p4 = scmp.ge.s32.totalorder %s1854_s27, 1  ;;  %p1958_p5 = por %p181_p2, %p180_p1 }
   0xa   : > { %p232_p6 = scmp.lt.s32.totalorder %s1854_s27, 5  ;;  %s2364_s29 = smov (%p30_p3, %s2362_s29), 0 }
   0xb   : > { %s165_s9 = ssub.s32 %s1850_s26, %s2364_s29  ;;  %s170_s11 = sadd.s32 1, %s1834_s22 }
   0xc   : > { %p233_p7 = pnand %p1568_p4, %p232_p6  ;;  %s167_s10 = sor.u32 %s166_s7, %s165_s9 }
   0xd   : > { %p168_p8 = scmp.eq.s32.totalorder %s167_s10, 0  ;;  %p265_p9 = scmp.lt.s32.totalorder (!%p233_p7), %s1842_s24, 1 }
   0xe   : > { %236 = sbr.rel (%p233_p7) target bundleno = 1140 (0x474), region = 44  ;;  %p267_p10 = scmp.lt.s32.totalorder (!%p233_p7), %s1838_s23, 1 }
   0xf   : > { %s1969_s12 = scalar_select %p168_p8, %s1834_s22, %s170_s11  }
  0x10   : > { %s1856_s10 = smov (!%p233_p7), 49   ;;  %s1857_s11 = smov (!%p233_p7), 47  }
  0x11   : > { %s1858_s13 = smov (!%p233_p7), 33   ;;  %s1859_s14 = smov (!%p233_p7), 31  }
  0x12   : > { %s2310_s30 = smov (!%p233_p7), 79   ;;  %s262_s7 = sand.u32 (!%p233_p7), 1, %s1830_s21  }
  0x13   : > { %v275_v0 = vld [vmem:[%s2308_s5] sm:$0x3]  ;;  %v279_v1 = vlaneseq  ;;  %s266_s15 = scalar_select %p265_p9, %s1842_s24, 1  ;;  %vm513_vm0 = vcmask 400384   ;;  %vm469_vm1 = vcmask 384000   ;;  %vm443_vm2 = vcmask 269312  }
  0x14   : > { %v277_v2 = vunpack.c.l.bf16 %v275_v0  ;;  %s268_s16 = scalar_select %p267_p10, %s1838_s23, 1  ;;  %vm399_vm3 = vcmask 252928   ;;  %vm303_vm4 = vcmask 121856   ;;  %vm374_vm5 = vcmask 138240  }
  0x15   : > { %v280_v3 = vshrl.u32 %v279_v1, 7  ;;  %s1571_s17 = sshll.u32 %s266_s15, 2  ;;  %s1860_s15 = smov 15   ;;  %vm345_vm6 = vcmask 1043458   ;;  %vm346_vm7 = vcmask 261126   ;;  %vm323_vm8 = vcmask 1041408  }
  0x16   : > { %s1570_s18 = sshll.u32 %s268_s16, 1  ;;  %s1861_s16 = smov 17   ;;  %vm324_vm9 = vcmask 259076   ;;  %vm2321_vm10 = vcmask 654336   ;;  %vm2017_vm11 = vmor %vm346_vm7, %vm345_vm6  ;;  %vm435_vm12 = vcmask 785408   ;;  %vm342_vm14 = vcmask 916480  }
  0x17   : > { %v352_v4 = vsub.s32 1, %v280_v3  ;;  %v356_v5 = vsub.s32 3, %v280_v3  ;;  %v1976_v6 = vsub.s32 0, %v280_v3  ;;  %v285_v7 = vsub.s32 2, %v280_v3  ;;  %s271_s19 = sadd.s32 %s1571_s17, %s1570_s18  ;;  %s2315_s17 = smov 80   ;;  %vm2025_vm13 = vmor %vm324_vm9, %vm323_vm8 }
  0x18   : > { %s1572_s20 = sshll.u32 %s271_s19, 2  ;;  %s1863_s18 = smov 96   ;;  %vm2319_vm15 = vcmask 662528   ;;  %vm2320_vm6 = vcmask 646144   ;;  %vm2324_vm7 = vcmask 777216   ;;  %vm2325_vm9 = vcmask 924672  }
  0x19   : > { %v353_v8 = vrot.slane %v277_v2, %v352_v4  ;;  %v357_v9 = vrot.slane %v277_v2, %v356_v5  ;;  %v282_v10 = vrot.slane %v277_v2, %v1976_v6  ;;  %v286_v11 = vrot.slane %v277_v2, %v285_v7  ;;  %s273_s9 = scalar_lea.vmem %s2303_s0, %s1572_s20  ;;  %s1864_s19 = smov 112  }
  0x1a   : > { %v1988_v18 = vld [vmem:[%s273_s9] sm:$0xff]  ;;  %s2311_s20 = smov 81   ;;  %s2021_s9 = sshll.u32 %s262_s7, 6 }
  0x1b   : > { %v363_v12 = vrot.slane %v353_v8, %v352_v4  ;;  %v367_v13 = vrot.slane %v357_v9, %v352_v4  ;;  %v292_v14 = vrot.slane %v282_v10, %v1976_v6  ;;  %v296_v15 = vrot.slane %v286_v11, %v1976_v6  ;;  %s2312_s21 = smov 95   ;;  %s2314_s7 = smov 113   ;;  %v541_v9 = vld [vmem:[%s2305_s2] sm:$0xff]  ;;  %v542_v10 = vld [vmem:[%s2305_s2 + $0x8] sm:$0xff] }
  0x1c   : > { %v492_v19 = vcombine.high %v1988_v18, %v1988_v18  ;;  %v1871_v8 = vmov 0   ;;  %p1593_p11 = scmp.ne.s32.totalorder %s1838_s23, 0 }
  0x1d   : > { %v370_v16 = vcombine.low %v363_v12, %v367_v13  ;;  %v299_v17 = vcombine.low %v292_v14, %v296_v15  ;;  %625 = vmatprep.mubr.bf16.mxu0 %v1871_v8  ;;  %1776 = vset.pattern.permute.xlu1 %v1871_v8 }
  0x1e   : > { %v1639_v20 = vpack.c.bf16 %v492_v19, %v1988_v18  ;;  %1777 = vset.pattern.permute.xlu0 %v1871_v8 }
  0x1f   : > { %510 = vrot.lane.b32.xlu0 %v370_v16, %s1856_s10  ;;  %466 = vrot.lane.b32.xlu1 %v299_v17, %s1857_s11 }
  0x20   : > { %v501_v21 = vrot.slane %v1639_v20, 6 }
  0x23   : > { %440 = vrot.lane.b32.xlu0 %v370_v16, %s1858_s13  ;;  %396 = vrot.lane.b32.xlu1 %v299_v17, %s1859_s14 }
  0x27   : > { %300 = vrot.lane.b32.xlu0 %v299_v17, %s1860_s15  ;;  %371 = vrot.lane.b32.xlu1 %v370_v16, %s1861_s16 }
  0x2b   : > { %502 = vrot.lane.b32.xlu0 %v501_v21, %s2315_s17  ;;  %432 = vrot.lane.b32.xlu1 %v1639_v20, %s1863_s18 }
  0x2f   : > { %339 = vrot.lane.b32.xlu0 %v501_v21, %s1864_s19 }
  0x91   : > { %v511_v22 = vpop.permute.xlu0 %510  ;;  %v467_v23 = vpop.permute.xlu1 %466 }
  0x92   : > { %v512_v24 = vrot.slane %v511_v22, 4  ;;  %v468_v25 = vrot.slane %v467_v23, 4 }
  0x94   : > { %v514_v26 = vsel %vm513_vm0, %v512_v24, %v511_v22  ;;  %v470_v27 = vsel %vm469_vm1, %v468_v25, %v467_v23 }
  0x95   : > { %v516_v28 = vmul.f32 %v514_v26, %v1988_v18  ;;  %v472_v29 = vmul.f32 %v1988_v18, %v470_v27  ;;  %v441_v30 = vpop.permute.xlu0 %440  ;;  %v397_v31 = vpop.permute.xlu1 %396 }
  0x96   : > { %v442_v32 = vrot.slane %v441_v30, 4  ;;  %v398_v33 = vrot.slane %v397_v31, 4 }
  0x97   : > { %v518_v34 = vcombine.high %v516_v28, %v516_v28  ;;  %v474_v35 = vcombine.high %v472_v29, %v472_v29 }
  0x98   : > { %v444_v36 = vsel %vm443_vm2, %v442_v32, %v441_v30  ;;  %v400_v37 = vsel %vm399_vm3, %v398_v33, %v397_v31 }
  0x99   : > { %v446_v38 = vmul.f32 %v1988_v18, %v444_v36  ;;  %v402_v39 = vmul.f32 %v1988_v18, %v400_v37  ;;  %v301_v40 = vpop.permute.xlu0 %300  ;;  %v372_v41 = vpop.permute.xlu1 %371  ;;  %v1638_v42 = vpack.c.bf16 %v474_v35, %v472_v29  ;;  %v1640_v43 = vpack.c.bf16 %v518_v34, %v516_v28  ;;  %v1787_v37 = vld [vmem:[%s2304_s1] sm:$0xff]  }
  0x9a   : > { %v302_v44 = vrot.slane %v301_v40, 4  ;;  %v373_v45 = vrot.slane %v372_v41, 4 }
  0x9b   : > { %v448_v46 = vcombine.high %v446_v38, %v446_v38  ;;  %v404_v47 = vcombine.high %v402_v39, %v402_v39  ;;  %483 = vrot.lane.b32.xlu1 %v1638_v42, %s2311_s20  ;;  %527 = vrot.lane.b32.xlu0 %v1640_v43, %s2310_s30  ;;  %s2317_s30 = smov 97   ;;  %s1870_s20 = smov 111  }
  0x9c   : > { %v304_v48 = vsel %vm303_vm4, %v302_v44, %v301_v40  ;;  %v375_v49 = vsel %vm374_vm5, %v373_v45, %v372_v41 }
  0x9d   : > { %v306_v50 = vmul.f32 %v1988_v18, %v304_v48  ;;  %v377_v51 = vmul.f32 %v1988_v18, %v375_v49  ;;  %v1637_v52 = vpack.c.bf16 %v448_v46, %v446_v38  ;;  %v503_v54 = vpop.permute.xlu0 %502  ;;  %v433_v55 = vpop.permute.xlu1 %432  ;;  %v1635_v61 = vpack.c.bf16 %v404_v47, %v402_v39 }
  0x9e   : > { %v504_v56 = vrot.slane %v503_v54, 4  ;;  %v434_v57 = vrot.slane %v433_v55, 4 }
  0x9f   : > { %v308_v59 = vcombine.high %v306_v50, %v306_v50  ;;  %v457_v60 = vrot.slane %v1637_v52, 6  ;;  %v379_v0 = vcombine.high %v377_v51, %v377_v51  ;;  %v413_v4 = vrot.slane %v1635_v61, 6 }
  0xa0   : > { %v506_v62 = vsel %vm2321_vm10, %v503_v54, %v504_v56  ;;  %v436_v63 = vsel %vm435_vm12, %v433_v55, %v434_v57  ;;  %vm658_vm10 = vcmask 392196  }
  0xa1   : > { %458 = vrot.lane.b32.xlu0 %v457_v60, %s2312_s21  ;;  %v1632_v1 = vpack.c.bf16 %v308_v59, %v306_v50  ;;  %508 = vst.msk [vmem:[#allocation2 + $0x18] sm:$0xcc] %vm2017_vm11, %v506_v62  ;;  %v340_v2 = vpop.permute.xlu0 %339  ;;  %v1634_v7 = vpack.c.bf16 %v379_v0, %v377_v51  ;;  %s1872_s21 = smov 16  }
  0xa2   : > { %438 = vst.msk [vmem:[#allocation2 + $0x10] sm:$0x33] %vm2025_vm13, %v436_v63  ;;  %v341_v3 = vrot.slane %v340_v2, 4 }
  0xa3   : > { %317 = vrot.lane.b32.xlu1 %v1632_v1, %s2314_s7  ;;  %s2080_s7 = scalar_lea.vmem [#allocation4], %s2021_s9 }
  0xa4   : > { %v343_v5 = vsel %vm342_vm14, %v340_v2, %v341_v3 }
  0xa5   : > { %414 = vrot.lane.b32.xlu0 %v413_v4, %s2317_s30  ;;  %348 = vst.msk [vmem:[#allocation2] sm:$0xcc] %vm2017_vm11, %v343_v5 }
  0xa7   : > { %388 = vrot.lane.b32.xlu1 %v1634_v7, %s1870_s20 }
  0xa9   : > { %550 = vperm.xlu0 %1777, %v542_v10  }
  0xab   : > { %545 = vperm.xlu1 %1776, %v541_v9  }
 0x10d   : > { %v484_v11 = vpop.permute.xlu1 %483  ;;  %v528_v12 = vpop.permute.xlu0 %527 }
 0x10e   : > { %v485_v13 = vrot.slane %v484_v11, 4  ;;  %v529_v14 = vrot.slane %v528_v12, 4 }
 0x110   : > { %v487_v15 = vsel %vm2319_vm15, %v484_v11, %v485_v13  ;;  %v531_v16 = vsel %vm2320_vm6, %v528_v12, %v529_v14  ;;  %vm417_vm15 = vcmask 793600   ;;  %vm2322_vm6 = vcmask 908288  }
 0x111   : > { %489 = vst.msk [vmem:[#allocation2 + $0x18] sm:$0x33] %vm2025_vm13, %v487_v15  ;;  %533 = vst.msk [vmem:[#allocation2 + $0x20] sm:$0x33] %vm2025_vm13, %v531_v16 }
 0x113   : > { %v459_v17 = vpop.permute.xlu0 %458 }
 0x114   : > { %v460_v18 = vrot.slane %v459_v17, 4 }
 0x115   : > { %v318_v19 = vpop.permute.xlu1 %317 }
 0x116   : > { %v462_v20 = vsel %vm2324_vm7, %v459_v17, %v460_v18  ;;  %v319_v21 = vrot.slane %v318_v19, 4  ;;  %vm662_vm7 = vcmask 126072  }
 0x117   : > { %464 = vst.msk [vmem:[#allocation2 + $0x10] sm:$0xcc] %vm2017_vm11, %v462_v20  ;;  %v415_v22 = vpop.permute.xlu0 %414 }
 0x118   : > { %v321_v23 = vsel %vm2325_vm9, %v318_v19, %v319_v21  ;;  %v416_v24 = vrot.slane %v415_v22, 4  ;;  %v540_v25 = vld [vmem:[#allocation2 + $0x20] sm:$0x33]  ;;  %vm665_vm9 = vcmask 396672  }
 0x119   : > { %v389_v26 = vpop.permute.xlu1 %388  ;;  %326 = vst.msk [vmem:[#allocation2] sm:$0x33] %vm2025_vm13, %v321_v23  ;;  %v1588_v27 = vcombine.high %v540_v25, %v540_v25  ;;  %v1587_v28 = vcombine.low %v540_v25, %v540_v25 }
 0x11a   : > { %v418_v29 = vsel %vm417_vm15, %v415_v22, %v416_v24  ;;  %v390_v30 = vrot.slane %v389_v26, 4 }
 0x11b   : > { %420 = vst.msk [vmem:[#allocation2 + $0x8] sm:$0xcc] %vm2017_vm11, %v418_v29  ;;  %1589 = vmatprep.subr.msk.bf16.mxu0 %vm323_vm8, %v1588_v27  ;;  %v588_v31 = vsel %vm323_vm8, %v1587_v28, 0  ;;  %vm2323_vm11 = vcmask 293888  }
 0x11c   : > { %v392_v32 = vsel %vm2322_vm6, %v389_v26, %v390_v30  ;;  %604 = vmatpush1.bf16.msra.mxu0 %v588_v31  ;;  %vm652_vm6 = vcmask 130048  }
 0x11d   : > { %394 = vst.msk [vmem:[#allocation2 + $0x8] sm:$0x33] %vm2025_vm13, %v392_v32  ;;  %vm657_vm13 = vcmask 1043584  }
 0x11e   : > { %v1781_v33 = vld [vmem:[#allocation2 + $0x14] ss:$8 sps:$4 sm:$0xff]   ;;  %v1783_v34 = vld [vmem:[#allocation2 + $0x10] ss:$8 sps:$4 sm:$0xff]  }
 0x11f   : > { %605 = vmatprep.subr.bf16.mxu0 %v1781_v33 }
 0x120   : > { %606 = vmatpush1.bf16.msra.mxu0 %v1783_v34 }
 0x124   : > { %v1784_v35 = vld [vmem:[#allocation2 + $0x4] ss:$8 sps:$4 sm:$0xff]   ;;  %v1786_v36 = vld [vmem:[#allocation2] ss:$8 sps:$4 sm:$0xff]   ;;  %v551_v43 = vpop.permute.xlu0 %550 }
 0x125   : > { %607 = vmatprep.subr.bf16.mxu0 %v1784_v35 }
 0x126   : > { %608 = vmatpush1.bf16.msra.mxu0 %v1786_v36  ;;  %v546_v39 = vpop.permute.xlu1 %545 }
 0x129   : > { %1590 = vmatmul.mubr.msk.bf16.vlgmr.msra.gmra.mxu0 %vm2323_vm11, %v1787_v37  ;;  %vm659_vm11 = vmor %vm658_vm10, %vm657_vm13 }
 0x1e9   : > { %v627_v38 = vpop.f32.mrf.mxu0 }
 0x1ea   : > { %v628_v41 = vadd.f32 %v627_v38, %v546_v39 }
 0x1eb   : > { %v629_v40 = vpop.f32.mrf.mxu0 }
 0x1ec   : > { %v630_v42 = vadd.f32 %v629_v40, %v546_v39 }
 0x1ed   : > { %v631_v44 = vpop.f32.mrf.mxu0 }
 0x1ee   : > { %v1641_v45 = vpack.c.bf16 %v630_v42, %v628_v41  ;;  %v632_v47 = vadd.f32 %v631_v44, %v551_v43 }
 0x1ef   : > { %v633_v46 = vpop.f32.mrf.mxu0 }
 0x1f0   : > { %v634_v48 = vadd.f32 %v633_v46, %v551_v43  ;;  %646 = vrot.lane.b32.xlu1 %v1641_v45, %s1872_s21 }
 0x1f2   : > { %v1642_v49 = vpack.c.bf16 %v634_v48, %v632_v47 }
 0x1f4   : > { %648 = vrot.lane.b32.xlu1 %v1642_v49, %s1872_s21 }
 0x262   : > { %v647_v50 = vpop.permute.xlu1 %646 }
 0x263   : > { %v650_v51 = vrot.slane %v647_v50, 4 }
 0x265   : > { %v653_v52 = vsel %vm652_vm6, %v650_v51, %v647_v50 }
 0x266   : > { %660 = vst.msk [vmem:[#allocation3] sm:$0xff] %vm659_vm11, %v653_v52  ;;  %v649_v53 = vpop.permute.xlu1 %648 }
 0x267   : > { %663 = vst.msk [vmem:[#allocation3] sm:$0xf] %vm662_vm7, %v1871_v8  ;;  %v651_v54 = vrot.slane %v649_v53, 4 }
 0x268   : > { %666 = vst.msk [vmem:[#allocation3 + $0x4] sm:$0xf] %vm665_vm9, %v1871_v8  ;;  %671 = sbr.rel (%p1593_p11) target bundleno = 623 (0x26f), region = 48 }
 0x269   : > { %v654_v55 = vsel %vm652_vm6, %v651_v54, %v649_v53 }
 0x26a   : > { %661 = vst.msk [vmem:[#allocation3 + $0x8] sm:$0xff] %vm659_vm11, %v654_v55 }
 0x26b   : > { %664 = vst.msk [vmem:[#allocation3 + $0x8] sm:$0xf] %vm662_vm7, %v1871_v8 }
 0x26c   : > { %667 = vst.msk [vmem:[#allocation3 + $0xc] sm:$0xf] %vm665_vm9, %v1871_v8 }
 0x26d   : > { %vm672_vm10 = vcmask 257152   ;;  %v1873_v56 = vmov 0  }
 0x26e   : > { %673 = vst.msk [vmem:[#allocation3] sm:$0xf] %vm672_vm10, %v1873_v56  ;;  %674 = vst.msk [vmem:[#allocation3 + $0x8] sm:$0xf] %vm672_vm10, %v1873_v56 }
 0x26f PF: > { %p1594_p12 = scmp.ne.s32.totalorder %s1838_s23, 1 }
 0x271   : > { %678 = sbr.rel (%p1594_p12) target bundleno = 632 (0x278), region = 52 }
 0x276   : > { %vm679_vm13 = vcmask 388352   ;;  %v1874_v57 = vmov 0  }
 0x277   : > { %680 = vst.msk [vmem:[#allocation3 + $0x4] sm:$0xf] %vm679_vm13, %v1874_v57  ;;  %681 = vst.msk [vmem:[#allocation3 + $0xc] sm:$0xf] %vm679_vm13, %v1874_v57 }
 0x278 PF: > { %v682_v58 = vld [vmem:[%s2308_s5] sm:$0x1]  ;;  %1789 = vset.pattern.permute.xlu1 %v1871_v8  ;;  %1788 = vset.pattern.permute.xlu0 %v1871_v8  ;;  %v1875_v24 = vmov 0.0   ;;  %vm2343_vm6 = vcmask 293888   ;;  %vm2344_vm7 = vcmask 646144  }
 0x279   : > { %v685_v59 = vpack.i.b16 %v682_v58, %v682_v58  ;;  %v895_v60 = vshrl.u32 %v682_v58, 16  ;;  %1659 = vmatprep.subr.bf16.mxu1 %v1875_v24  ;;  %1669 = vmatprep.subr.bf16.mxu0 %v1875_v24 }
 0x27b   : > { %v690_v61 = vrot.slane %v685_v59, %v1976_v6  ;;  %v896_v62 = vpack.i.b16 %v895_v60, %v895_v60 }
 0x27d   : > { %v1595_v63 = vcombine.low %v690_v61, %v690_v61  ;;  %v901_v0 = vrot.slane %v896_v62, %v1976_v6 }
 0x27e   : > { %v780_v2 = vld [vmem:[#allocation3 + $0x8] sm:$0xcc]  ;;  %v744_v4 = vld [vmem:[#allocation3] sm:$0x33]  ;;  %v710_v5 = vld [vmem:[#allocation3 + $0x8] sm:$0x33] }
 0x27f   : > { %730 = vrot.lane.b32.xlu0 %v1595_v63, %s1859_s14  ;;  %v1605_v1 = vcombine.low %v901_v0, %v901_v0  ;;  %v1599_v3 = vrot.slane %v780_v2, 10  ;;  %v752_v6 = vld [vmem:[#allocation3] sm:$0xcc]  ;;  %v771_v7 = vld [vmem:[#allocation3 + $0x8] sm:$0x33]  ;;  %v712_v8 = vrot.slane %v710_v5, 6 }
 0x280   : > { %v773_v9 = vrot.slane %v771_v7, 6  ;;  %v719_v10 = vld [vmem:[#allocation3 + $0x8] sm:$0xcc]  ;;  %v928_v13 = vld [vmem:[#allocation3] sm:$0xcc]  ;;  %s2334_s14 = smov 95  }
 0x281   : > { %939 = vrot.lane.b32.xlu1 %v1605_v1, %s1858_s13  ;;  %v962_v11 = vld [vmem:[#allocation3 + $0x8] sm:$0xcc]  ;;  %v1597_v12 = vrot.slane %v719_v10, 10  ;;  %v878_v14 = vld [vmem:[#allocation3 + $0x8] sm:$0x33]  ;;  %v1606_v15 = vrot.slane %v928_v13, 10 }
 0x282   : > { %v1106_v16 = vld [vmem:[#allocation3 + $0x8] sm:$0x33]  ;;  %v1078_v17 = vld [vmem:[#allocation3] sm:$0x33]  ;;  %v1148_v19 = vld [vmem:[#allocation3] sm:$0xcc] }
 0x283   : > { %694 = vrot.lane.b32.xlu0 %v1595_v63, %s1860_s15  ;;  %v954_v18 = vld [vmem:[#allocation3 + $0x8] sm:$0x33]  ;;  %v1080_v20 = vrot.slane %v1078_v17, 6  ;;  %v1615_v21 = vrot.slane %v1148_v19, 10  ;;  %v886_v22 = vld [vmem:[#allocation3 + $0x8] sm:$0xcc] }
 0x284   : > { %v919_v23 = vld [vmem:[#allocation3] sm:$0x33]  ;;  %v1114_v26 = vld [vmem:[#allocation3 + $0x8] sm:$0xcc]  ;;  %v729_v31 = vld [vmem:[#allocation3] sm:$0xcc] }
 0x285   : > { %905 = vrot.lane.b32.xlu1 %v1605_v1, %s1861_s16  ;;  %v921_v25 = vrot.slane %v919_v23, 6  ;;  %v1139_v27 = vld [vmem:[#allocation3] sm:$0x33]  ;;  %v760_v32 = vld [vmem:[#allocation3 + $0x8] sm:$0xcc]  ;;  %s2333_s13 = smov 113  }
 0x286   : > { %v1141_v28 = vrot.slane %v1139_v27, 6  ;;  %v683_v40 = vld [vmem:[#allocation3 + $0x8] sm:$0xcc]  ;;  %v970_v49 = vld [vmem:[#allocation3 + $0x8] sm:$0x33]  ;;  %s2335_s15 = smov 81  }
 0x287   : > { %1123 = vrot.lane.b32.xlu0 %v1595_v63, %s1857_s11  ;;  %s2332_s11 = smov 97   ;;  %v1087_v50 = vld [vmem:[#allocation3] sm:$0xcc]  ;;  %v894_v59 = vld [vmem:[#allocation3 + $0x8] sm:$0x33]  ;;  %s2336_s16 = smov 79  }
 0x288   : > { %v1067_v53 = vld [vmem:[#allocation3] sm:$0xcc]  ;;  %v1613_v55 = vrot.slane %v1087_v50, 10  ;;  %v1316_v17 = vld [vmem:[#allocation3] sm:$0x33] }
 0x289   : > { %1317 = vrot.lane.b32.xlu1 %v1605_v1, %s1856_s10  ;;  %s2331_s10 = smov 80   ;;  %v1122_v60 = vld [vmem:[#allocation3] sm:$0xcc]  ;;  %v1300_v27 = vld [vmem:[#allocation3] sm:$0x33] }
 0x28a   : > { %v798_v50 = vld [vmem:[%s2307_s4 + $0x8] sm:$0xff] }
 0x28b   : > { %784 = vrot.lane.b32.xlu0 %v1599_v3, %s1863_s18 }
 0x28d   : > { %746 = vrot.lane.b32.xlu1 %v744_v4, %s1863_s18 }
 0x28f   : > { %754 = vrot.lane.b32.xlu0 %v752_v6, %s1863_s18  ;;  %v1280_v6 = vld [vmem:[#allocation3 + $0x8] sm:$0xcc] }
 0x291   : > { %713 = vrot.lane.b32.xlu1 %v712_v8, %s1864_s19 }
 0x293   : > { %774 = vrot.lane.b32.xlu0 %v773_v9, %s1863_s18 }
 0x295   : > { %964 = vrot.lane.b32.xlu1 %v962_v11, %s1863_s18 }
 0x297   : > { %723 = vrot.lane.b32.xlu0 %v1597_v12, %s1864_s19 }
 0x299   : > { %880 = vrot.lane.b32.xlu1 %v878_v14, %s1864_s19  ;;  %v1621_v14 = vrot.slane %v1280_v6, 10 }
 0x29b   : > { %932 = vrot.lane.b32.xlu0 %v1606_v15, %s1863_s18 }
 0x29d   : > { %1108 = vrot.lane.b32.xlu1 %v1106_v16, %s1863_s18 }
 0x29f   : > { %956 = vrot.lane.b32.xlu0 %v954_v18, %s1863_s18  ;;  %v938_v18 = vld [vmem:[#allocation3] sm:$0x33] }
 0x2a1   : > { %1081 = vrot.lane.b32.xlu1 %v1080_v20, %s1863_s18 }
 0x2a3   : > { %1152 = vrot.lane.b32.xlu0 %v1615_v21, %s2331_s10 }
 0x2a7   : > { %888 = vrot.lane.b32.xlu0 %v886_v22, %s1864_s19 }
 0x2ab   : > { %922 = vrot.lane.b32.xlu0 %v921_v25, %s1863_s18 }
 0x2af   : > { %1116 = vrot.lane.b32.xlu0 %v1114_v26, %s1863_s18 }
 0x2b3   : > { %1142 = vrot.lane.b32.xlu0 %v1141_v28, %s2331_s10 }
 0x2f1   : > { %v731_v29 = vpop.permute.xlu0 %730 }
 0x2f2   : > { %v732_v30 = vrot.slane %v731_v29, 4 }
 0x2f3   : > { %v940_v33 = vpop.permute.xlu1 %939 }
 0x2f4   : > { %v2117_v34 = vsel %vm399_vm3, %v732_v30, %v731_v29  ;;  %v941_v39 = vrot.slane %v940_v33, 4  ;;  %vm2339_vm3 = vcmask 908288  }
 0x2f5   : > { %v695_v35 = vpop.permute.xlu0 %694  ;;  %v736_v36 = vmul.bf16 %v2117_v34, %v729_v31  ;;  %v761_v37 = vmul.bf16 %v760_v32, %v2117_v34  ;;  %v1068_v62 = vmul.bf16 %v1067_v53, %v2117_v34 }
 0x2f6   : > { %v696_v38 = vrot.slane %v695_v35, 4  ;;  %v2124_v46 = vsel %vm443_vm2, %v941_v39, %v940_v33  ;;  %v1246_v33 = vld [vmem:[#allocation3] sm:$0x33]  ;;  %vm2338_vm2 = vcmask 777216  }
 0x2f7   : > { %738 = vrot.lane.b32.xlu1 %v736_v36, %s2332_s11  ;;  %v906_v41 = vpop.permute.xlu1 %905  ;;  %v1598_v43 = vrot.slane %v761_v37, 10  ;;  %v971_v54 = vmul.bf16 %v970_v49, %v2124_v46  ;;  %v1612_v9 = vrot.slane %v1068_v62, 10  ;;  %v945_v25 = vmul.bf16 %v2124_v46, %v938_v18  ;;  %v1262_v37 = vld [vmem:[#allocation3] sm:$0x33]  ;;  %v797_v49 = vld [vmem:[%s2307_s4] sm:$0xff]  ;;  %vm2345_vm9 = vmmov %vm2338_vm2 }
 0x2f8   : > { %v698_v42 = vsel %vm303_vm4, %v696_v38, %v695_v35  ;;  %v907_v47 = vrot.slane %v906_v41, 4  ;;  %v1097_v35 = vld [vmem:[#allocation3 + $0x8] sm:$0xcc]  ;;  %vm2340_vm4 = vcmask 654336   ;;  %vm2349_vm13 = vmmov %vm2338_vm2 }
 0x2f9   : > { %v700_v44 = vmul.bf16 %v698_v42, %v683_v40  ;;  %v1124_v45 = vpop.permute.xlu0 %1123  ;;  %v947_v31 = vrot.slane %v945_v25, 6  ;;  %v1098_v40 = vmul.bf16 %v1097_v35, %v2117_v34  ;;  %v1308_v42 = vld [vmem:[#allocation3] sm:$0xcc]  ;;  %vm2346_vm11 = vmmov %vm2340_vm4 }
 0x2fa   : > { %v1125_v48 = vrot.slane %v1124_v45, 4  ;;  %v909_v57 = vsel %vm374_vm5, %v907_v47, %v906_v41  ;;  %v1263_v41 = vmul.bf16 %v1262_v37, %v2124_v46  ;;  %v1271_v47 = vld [vmem:[#allocation3 + $0x8] sm:$0x33]  ;;  %vm2341_vm5 = vmmov %vm2340_vm4 }
 0x2fb   : > { %765 = vrot.lane.b32.xlu1 %v1598_v43, %s2332_s11  ;;  %v1596_v51 = vrot.slane %v700_v44, 10  ;;  %v1318_v52 = vpop.permute.xlu1 %1317  ;;  %v911_v2 = vmul.bf16 %v909_v57, %v894_v59  ;;  %v1290_v43 = vld [vmem:[#allocation3 + $0x8] sm:$0x33]  ;;  %v1254_v44 = vld [vmem:[#allocation3] sm:$0xcc]  ;;  %v1273_v34 = vrot.slane %v1271_v47, 6  ;;  %vm2347_vm10 = vmmov %vm2340_vm4 }
 0x2fc   : > { %v1127_v58 = vsel %vm469_vm1, %v1125_v48, %v1124_v45  ;;  %v1319_v5 = vrot.slane %v1318_v52, 4  ;;  %vm1876_vm1 = vmmov 0   ;;  %v1291_v45 = vmul.bf16 %v1290_v43, %v2124_v46  ;;  %v1792_v43 = vld [vmem:[%s2306_s3] sm:$0xff]  }
 0x2fd   : > { %704 = vrot.lane.b32.xlu0 %v1596_v51, %s2333_s13  ;;  %v785_v56 = vpop.permute.xlu0 %784  ;;  %v1129_v3 = vmul.bf16 %v1127_v58, %v1122_v60  ;;  %1665 = vmatprep.mubr.msk.bf16.mxu1 %vm1876_vm1, %v1875_v24 }
 0x2fe   : > { %v786_v61 = vrot.slane %v785_v56, 4  ;;  %v1321_v16 = vsel %vm513_vm0, %v1319_v5, %v1318_v52  ;;  %1675 = vmatprep.mubr.msk.bf16.mxu0 %vm1876_vm1, %v1875_v24  ;;  %v1293_v48 = vrot.slane %v1291_v45, 6  ;;  %vm2337_vm0 = vcmask 924672  }
 0x2ff   : > { %973 = vrot.lane.b32.xlu1 %v971_v54, %s2334_s14  ;;  %v747_v63 = vpop.permute.xlu1 %746  ;;  %v1614_v13 = vrot.slane %v1129_v3, 10  ;;  %v1323_v23 = vmul.bf16 %v1321_v16, %v1316_v17 }
 0x300   : > { %v787_v0 = vsel %vm435_vm12, %v785_v56, %v786_v61  ;;  %v748_v1 = vrot.slane %v747_v63, 4 }
 0x301   : > { %1091 = vrot.lane.b32.xlu0 %v1613_v55, %s1863_s18  ;;  %789 = vst [vmem:[#allocation2 + $0x20] sm:$0x3] %v787_v0  ;;  %v755_v4 = vpop.permute.xlu0 %754 }
 0x302   : > { %v756_v7 = vrot.slane %v755_v4, 4  ;;  %v749_v8 = vsel %vm435_vm12, %v747_v63, %v748_v1 }
 0x303   : > { %913 = vrot.lane.b32.xlu1 %v911_v2, %s1870_s20  ;;  %751 = vst [vmem:[#allocation2 + $0x10] sm:$0x3] %v749_v8  ;;  %v714_v10 = vpop.permute.xlu1 %713 }
 0x304   : > { %v757_v11 = vsel %vm435_vm12, %v755_v4, %v756_v7  ;;  %v715_v12 = vrot.slane %v714_v10, 4 }
 0x305   : > { %1072 = vrot.lane.b32.xlu0 %v1612_v9, %s2332_s11  ;;  %759 = vst [vmem:[#allocation2 + $0x10] sm:$0xc] %v757_v11  ;;  %v775_v15 = vpop.permute.xlu0 %774 }
 0x306   : > { %v776_v19 = vrot.slane %v775_v15, 4  ;;  %v716_v20 = vsel %vm342_vm14, %v714_v10, %v715_v12 }
 0x307   : > { %1133 = vrot.lane.b32.xlu1 %v1614_v13, %s2335_s15  ;;  %718 = vst [vmem:[#allocation2] sm:$0xc] %v716_v20  ;;  %v965_v52 = vpop.permute.xlu1 %964 }
 0x308   : > { %v777_v21 = vsel %vm435_vm12, %v775_v15, %v776_v19  ;;  %v1790_v22 = vld [vmem:[#allocation2 + $0x20] ss:$0 sps:$4 sm:$0x33]   ;;  %v966_v9 = vrot.slane %v965_v52, 4 }
 0x309   : > { %1284 = vrot.lane.b32.xlu0 %v1621_v14, %s1863_s18  ;;  %779 = vst [vmem:[#allocation2 + $0x18] sm:$0xc] %v777_v21  ;;  %v724_v26 = vpop.permute.xlu0 %723  ;;  %v833_v29 = vsel %vm323_vm8, %v1790_v22, 0 }
 0x30a   : > { %v725_v28 = vrot.slane %v724_v26, 4  ;;  %1660 = vmatpush3.bf16.msra.mxu1 %v833_v29  ;;  %v967_v19 = vsel %vm435_vm12, %v965_v52, %v966_v9 }
 0x30b   : > { %1325 = vrot.lane.b32.xlu1 %v1323_v23, %s2336_s16  ;;  %1661 = vmatprep.subr.bf16.mxu1 %v1875_v24  ;;  %v881_v54 = vpop.permute.xlu1 %880  ;;  %s1628_s16 = sshll.u32 (%p1958_p5), %s1842_s24, 4 }
 0x30c   : > { %v726_v30 = vsel %vm342_vm14, %v724_v26, %v725_v28  ;;  %v2155_v38 = vld [vmem:[#allocation2 + $0x10] sm:$0xf]  ;;  %v882_v15 = vrot.slane %v881_v54, 4  ;;  %s1427_s19 = sadd.s32 (%p1958_p5), %s1838_s23, %s1628_s16 }
 0x30d   : > { %1302 = vrot.lane.b32.xlu0 %v1300_v27, %s2331_s10  ;;  %728 = vst [vmem:[#allocation2 + $0x8] sm:$0x3] %v726_v30  ;;  %v933_v32 = vpop.permute.xlu0 %932  ;;  %s1629_s8 = sshll.u32 (%p1958_p5), %s1427_s19, 3 }
 0x30e   : > { %v934_v36 = vrot.slane %v933_v32, 4  ;;  %v883_v27 = vsel %vm342_vm14, %v881_v54, %v882_v15  ;;  %s1429_s21 = scalar_lea.vmem (%p1958_p5), %s2309_s6, %s1629_s8 }
 0x30f   : > { %948 = vrot.lane.b32.xlu1 %v947_v31, %s2334_s14  ;;  %v2174_v56 = vpop.permute.xlu1 %1108 }
 0x310   : > { %v935_v39 = vsel %vm435_vm12, %v933_v32, %v934_v36 }
 0x311   : > { %1248 = vrot.lane.b32.xlu0 %v1246_v33, %s1863_s18  ;;  %937 = vst [vmem:[#allocation2 + $0x10] sm:$0x3] %v935_v39  ;;  %v957_v46 = vpop.permute.xlu0 %956 }
 0x312   : > { %v958_v10 = vrot.slane %v957_v46, 4 }
 0x313   : > { %1100 = vrot.lane.b32.xlu1 %v1098_v40, %s2332_s11  ;;  %v2178_v58 = vpop.permute.xlu1 %1081 }
 0x314   : > { %v959_v20 = vsel %vm435_vm12, %v957_v46, %v958_v10  ;;  %v1083_v39 = vrot.slane %v2178_v58, 4 }
 0x315   : > { %1265 = vrot.lane.b32.xlu0 %v1263_v41, %s2334_s14  ;;  %v1153_v51 = vpop.permute.xlu0 %1152 }
 0x316   : > { %v1154_v21 = vrot.slane %v1153_v51, 4  ;;  %v1084_v46 = vsel %vm435_vm12, %v2178_v58, %v1083_v39 }
 0x317   : > { %1310 = vrot.lane.b32.xlu1 %v1308_v42, %s2331_s10 }
 0x318   : > { %v1155_v33 = vsel %vm2340_vm4, %v1153_v51, %v1154_v21 }
 0x319   : > { %801 = vperm.xlu0 %1788, %v797_v49   ;;  %v889_v53 = vpop.permute.xlu0 %888 }
 0x31a   : > { %v890_v16 = vrot.slane %v889_v53, 4 }
 0x31b   : > { %1256 = vrot.lane.b32.xlu1 %v1254_v44, %s1863_s18 }
 0x31c   : > { %v891_v28 = vsel %vm342_vm14, %v889_v53, %v890_v16  ;;  %vm2342_vm14 = vcmask 662528  }
 0x31d   : > { %995 = vperm.xlu0 %1788, %v798_v50   ;;  %v923_v55 = vpop.permute.xlu0 %922 }
 0x31e   : > { %v924_v2 = vrot.slane %v923_v55, 4 }
 0x31f   : > { %1294 = vrot.lane.b32.xlu1 %v1293_v48, %s2334_s14 }
 0x320   : > { %v925_v11 = vsel %vm435_vm12, %v923_v55, %v924_v2  ;;  %v1110_v2 = vrot.slane %v2174_v56, 4 }
 0x321   : > { %1174 = vperm.xlu0 %1788, %v798_v50   ;;  %v2176_v57 = vpop.permute.xlu0 %1116 }
 0x323   : > { %1274 = vrot.lane.b32.xlu1 %v1273_v34, %s1863_s18 }
 0x325   : > { %1347 = vperm.xlu0 %1788, %v798_v50   ;;  %v2180_v60 = vpop.permute.xlu0 %1142 }
 0x326   : > { %v1144_v31 = vrot.slane %v2180_v60, 4 }
 0x327   : > { %806 = vperm.xlu1 %1789, %v798_v50  }
 0x328   : > { %v1145_v45 = vsel %vm2341_vm5, %v2180_v60, %v1144_v31 }
 0x32b   : > { %990 = vperm.xlu1 %1789, %v797_v49  }
 0x32f   : > { %1169 = vperm.xlu1 %1789, %v797_v49  }
 0x333   : > { %1342 = vperm.xlu1 %1789, %v797_v49  }
 0x369   : > { %v739_v59 = vpop.permute.xlu1 %738 }
 0x36a   : > { %v740_v61 = vrot.slane %v739_v59, 4 }
 0x36c   : > { %v741_v62 = vsel %vm417_vm15, %v739_v59, %v740_v61 }
 0x36d   : > { %743 = vst [vmem:[#allocation2 + $0x8] sm:$0xc] %v741_v62  ;;  %v766_v63 = vpop.permute.xlu1 %765 }
 0x36e   : > { %v767_v0 = vrot.slane %v766_v63, 4 }
 0x36f   : > { %v705_v1 = vpop.permute.xlu0 %704 }
 0x370   : > { %v768_v3 = vsel %vm417_vm15, %v766_v63, %v767_v0  ;;  %v706_v4 = vrot.slane %v705_v1, 4 }
 0x371   : > { %770 = vst [vmem:[#allocation2 + $0x18] sm:$0x3] %v768_v3  ;;  %v974_v5 = vpop.permute.xlu1 %973  ;;  %v1118_v3 = vrot.slane %v2176_v57, 4 }
 0x372   : > { %v707_v6 = vsel %vm2337_vm0, %v705_v1, %v706_v4  ;;  %v975_v7 = vrot.slane %v974_v5, 4  ;;  %vm2350_vm0 = vmmov %vm2343_vm6 }
 0x373   : > { %709 = vst [vmem:[#allocation2] sm:$0x3] %v707_v6  ;;  %v1092_v8 = vpop.permute.xlu0 %1091 }
 0x374   : > { %v793_v12 = vld [vmem:[#allocation2 + $0x8] sm:$0xf]  ;;  %v976_v13 = vsel %vm2338_vm2, %v974_v5, %v975_v7  ;;  %v1093_v30 = vrot.slane %v1092_v8, 4 }
 0x375   : > { %927 = vst [vmem:[#allocation2 + $0x8] sm:$0xc] %v925_v11  ;;  %978 = vst [vmem:[#allocation2 + $0x20] sm:$0x3] %v976_v13  ;;  %v914_v14 = vpop.permute.xlu1 %913  ;;  %v1111_v11 = vsel %vm435_vm12, %v2174_v56, %v1110_v2 }
 0x376   : > { %v915_v17 = vrot.slane %v914_v14, 4  ;;  %v1094_v40 = vsel %vm435_vm12, %v1092_v8, %v1093_v30 }
 0x377   : > { %v1073_v18 = vpop.permute.xlu0 %1072 }
 0x378   : > { %v795_v22 = vld [vmem:[#allocation2 + $0x18] sm:$0xf]  ;;  %v916_v23 = vsel %vm2339_vm3, %v914_v14, %v915_v17  ;;  %v1074_v41 = vrot.slane %v1073_v18, 4 }
 0x379   : > { %961 = vst [vmem:[#allocation2 + $0x18] sm:$0x3] %v959_v20  ;;  %969 = vst [vmem:[#allocation2 + $0x18] sm:$0xc] %v967_v19  ;;  %v1134_v25 = vpop.permute.xlu1 %1133  ;;  %v1602_v26 = vcombine.low %v2155_v38, %v795_v22 }
 0x37a   : > { %918 = vst [vmem:[#allocation2 + $0x8] sm:$0x3] %v916_v23  ;;  %v792_v29 = vld [vmem:[#allocation2] sm:$0xf]  ;;  %v1135_v35 = vrot.slane %v1134_v25, 4  ;;  %v1075_v52 = vsel %vm417_vm15, %v1073_v18, %v1074_v41 }
 0x37b   : > { %885 = vst [vmem:[#allocation2] sm:$0x3] %v883_v27  ;;  %893 = vst [vmem:[#allocation2] sm:$0xc] %v891_v28  ;;  %1662 = vmatpush3.bf16.msra.mxu1 %v1602_v26  ;;  %v2194_v32 = vpop.permute.xlu0 %1284  ;;  %v1601_v38 = vcombine.low %v792_v29, %v793_v12  ;;  %v1119_v12 = vsel %vm435_vm12, %v2176_v57, %v1118_v3 }
 0x37c   : > { %1663 = vmatprep.subr.bf16.mxu1 %v1875_v24  ;;  %v1791_v36 = vld [vmem:[#allocation2 + $0x20] ss:$0 sps:$4 sm:$0x33]   ;;  %v1136_v34 = vsel %vm2342_vm14, %v1134_v25, %v1135_v35  ;;  %v1286_v19 = vrot.slane %v2194_v32, 4 }
 0x37d   : > { %v1326_v37 = vpop.permute.xlu1 %1325  ;;  %1157 = vst [vmem:[#allocation2 + $0x20] sm:$0x3] %v1155_v33  ;;  %v1022_v42 = vsel %vm323_vm8, %v1791_v36, 0  ;;  %v1794_v25 = vld [vmem:[%s2306_s3] sm:$0xff]  }
 0x37e   : > { %1670 = vmatpush3.bf16.msra.mxu0 %v1022_v42  ;;  %v1327_v49 = vrot.slane %v1326_v37, 4  ;;  %v1287_v27 = vsel %vm435_vm12, %v2194_v32, %v1286_v19 }
 0x37f   : > { %1664 = vmatpush3.bf16.msra.mxu1 %v1601_v38  ;;  %v1303_v44 = vpop.permute.xlu0 %1302  ;;  %1671 = vmatprep.subr.bf16.mxu0 %v1875_v24 }
 0x380   : > { %v984_v48 = vld [vmem:[#allocation2 + $0x18] sm:$0xf]  ;;  %1679 = vmatprep.subr.bf16.mxu1 %v1875_v24  ;;  %v1304_v53 = vrot.slane %v1303_v44, 4  ;;  %v1328_v59 = vsel %vm2344_vm7, %v1326_v37, %v1327_v49  ;;  %v1796_v37 = vld [vmem:[%s2306_s3] sm:$0xff]  }
 0x381   : > { %v2206_v47 = vld [vmem:[#allocation2 + $0x8] sm:$0xf]  ;;  %1138 = vst [vmem:[#allocation2 + $0x18] sm:$0x3] %v1136_v34  ;;  %1147 = vst [vmem:[#allocation2 + $0x18] sm:$0xc] %v1145_v45  ;;  %v949_v50 = vpop.permute.xlu1 %948 }
 0x382   : > { %1096 = vst [vmem:[#allocation2 + $0x8] sm:$0x3] %v1094_v40  ;;  %v981_v51 = vld [vmem:[#allocation2] sm:$0xf]  ;;  %v950_v54 = vrot.slane %v949_v50, 4  ;;  %1666 = vmatmul.mubr.msk.bf16.vlgmr.msra.gmra.mxu1 %vm2343_vm6, %v1792_v43  ;;  %v1305_v63 = vsel %vm2346_vm11, %v1303_v44, %v1304_v53 }
 0x383   : > { %1086 = vst [vmem:[#allocation2] sm:$0xc] %v1084_v46  ;;  %1077 = vst [vmem:[#allocation2] sm:$0x3] %v1075_v52  ;;  %v1249_v55 = vpop.permute.xlu0 %1248  ;;  %1685 = vmatprep.mubr.msk.bf16.mxu1 %vm1876_vm1, %v1875_v24  ;;  %v1608_v22 = vcombine.low %v981_v51, %v2206_v47  ;;  %v1799_v40 = vld [vmem:[%s2306_s3] sm:$0xff]  }
 0x384   : > { %v951_v60 = vsel %vm2345_vm9, %v949_v50, %v950_v54  ;;  %v1250_v61 = vrot.slane %v1249_v55, 4  ;;  %v1793_v62 = vld [vmem:[#allocation2 + $0x20] ss:$0 sps:$4 sm:$0x33]  }
 0x385   : > { %953 = vst [vmem:[#allocation2 + $0x10] sm:$0xc] %v951_v60  ;;  %v1101_v58 = vpop.permute.xlu1 %1100  ;;  %1330 = vst [vmem:[#allocation2 + $0x20] sm:$0x3] %v1328_v59  ;;  %v1201_v1 = vsel %vm323_vm8, %v1793_v62, 0 }
 0x386   : > { %v1102_v0 = vrot.slane %v1101_v58, 4  ;;  %1680 = vmatpush3.bf16.msra.mxu1 %v1201_v1  ;;  %v1251_v5 = vsel %vm435_vm12, %v1249_v55, %v1250_v61 }
 0x387   : > { %1681 = vmatprep.subr.bf16.mxu1 %v1875_v24  ;;  %v1266_v7 = vpop.permute.xlu0 %1265 }
 0x388   : > { %v1163_v4 = vld [vmem:[#allocation2 + $0x18] sm:$0xf]  ;;  %v1103_v6 = vsel %vm417_vm15, %v1101_v58, %v1102_v0  ;;  %v1267_v14 = vrot.slane %v1266_v7, 4  ;;  %vm2348_vm15 = vmmov %vm2338_vm2 }
 0x389   : > { %1307 = vst [vmem:[#allocation2 + $0x18] sm:$0x3] %v1305_v63  ;;  %1105 = vst [vmem:[#allocation2 + $0x8] sm:$0xc] %v1103_v6  ;;  %v1311_v8 = vpop.permute.xlu1 %1310 }
 0x38a   : > { %v1160_v9 = vld [vmem:[#allocation2] sm:$0xf]  ;;  %v1312_v10 = vrot.slane %v1311_v8, 4  ;;  %v1268_v21 = vsel %vm2348_vm15, %v1266_v7, %v1267_v14 }
 0x38b   : > { %1253 = vst [vmem:[#allocation2] sm:$0x3] %v1251_v5 }
 0x38c   : > { %v983_v13 = vld [vmem:[#allocation2 + $0x10] sm:$0xf]  ;;  %v1313_v15 = vsel %vm2347_vm10, %v1311_v8, %v1312_v10  ;;  %v1795_v26 = vld [vmem:[#allocation2 + $0x20] ss:$0 sps:$4 sm:$0x33]  }
 0x38d   : > { %1113 = vst [vmem:[#allocation2 + $0x10] sm:$0x3] %v1111_v11  ;;  %1121 = vst [vmem:[#allocation2 + $0x10] sm:$0xc] %v1119_v12  ;;  %v1257_v16 = vpop.permute.xlu1 %1256  ;;  %v1609_v17 = vcombine.low %v983_v13, %v984_v48  ;;  %v1374_v35 = vsel %vm323_vm8, %v1795_v26, 0 }
 0x38e   : > { %1315 = vst [vmem:[#allocation2 + $0x18] sm:$0xc] %v1313_v15  ;;  %v1258_v18 = vrot.slane %v1257_v16, 4  ;;  %vm2351_vm8 = vmmov %vm2350_vm0 }
 0x38f   : > { %1672 = vmatpush3.bf16.msra.mxu0 %v1609_v17 }
 0x390   : > { %v1161_v20 = vld [vmem:[#allocation2 + $0x8] sm:$0xf]  ;;  %v1259_v56 = vsel %vm435_vm12, %v1257_v16, %v1258_v18  ;;  %1673 = vmatprep.subr.bf16.mxu0 %v1875_v24 }
 0x391   : > { %1270 = vst [vmem:[#allocation2 + $0x8] sm:$0x3] %v1268_v21  ;;  %1261 = vst [vmem:[#allocation2] sm:$0xc] %v1259_v56  ;;  %v1295_v57 = vpop.permute.xlu1 %1294  ;;  %v1617_v32 = vcombine.low %v1160_v9, %v1161_v20 }
 0x392   : > { %v1296_v23 = vrot.slane %v1295_v57, 4 }
 0x393   : > { %1674 = vmatpush3.bf16.msra.mxu0 %v1608_v22 }
 0x394   : > { %v1162_v28 = vld [vmem:[#allocation2 + $0x10] sm:$0xf]  ;;  %v1297_v29 = vsel %vm2349_vm13, %v1295_v57, %v1296_v23  ;;  %1689 = vmatprep.subr.bf16.mxu0 %v1875_v24  ;;  %v802_v41 = vpop.permute.xlu0 %801 }
 0x395   : > { %1289 = vst [vmem:[#allocation2 + $0x10] sm:$0x3] %v1287_v27  ;;  %1299 = vst [vmem:[#allocation2 + $0x10] sm:$0xc] %v1297_v29  ;;  %v1275_v30 = vpop.permute.xlu1 %1274  ;;  %v1618_v31 = vcombine.low %v1162_v28, %v1163_v4 }
 0x396   : > { %v1276_v33 = vrot.slane %v1275_v30, 4  ;;  %1676 = vmatmul.mubr.msk.bf16.vlgmr.msra.gmra.mxu0 %vm2350_vm0, %v1794_v25 }
 0x397   : > { %1682 = vmatpush3.bf16.msra.mxu1 %v1618_v31  ;;  %1690 = vmatpush3.bf16.msra.mxu0 %v1374_v35 }
 0x398   : > { %v1277_v36 = vsel %vm435_vm12, %v1275_v30, %v1276_v33  ;;  %1683 = vmatprep.subr.bf16.mxu1 %v1875_v24  ;;  %1691 = vmatprep.subr.bf16.mxu0 %v1875_v24  ;;  %vm2352_vm12 = vmmov %vm2350_vm0  ;;  %v996_v51 = vpop.permute.xlu0 %995 }
 0x399   : > { %1279 = vst [vmem:[#allocation2 + $0x8] sm:$0xc] %v1277_v36  ;;  %1695 = vmatprep.mubr.msk.bf16.mxu0 %vm1876_vm1, %v1875_v24 }
 0x39b   : > { %1684 = vmatpush3.bf16.msra.mxu1 %v1617_v32 }
 0x39c   : > { %v1797_v38 = vld [vmem:[#allocation2 + $0x10] ss:$8 sps:$4 sm:$0xff]   ;;  %v1175_v62 = vpop.permute.xlu0 %1174 }
 0x39d   : > { %1692 = vmatpush3.bf16.msra.mxu0 %v1797_v38 }
 0x39e   : > { %1686 = vmatmul.mubr.msk.bf16.vlgmr.msra.gmra.mxu1 %vm2351_vm8, %v1796_v37  ;;  %1693 = vmatprep.subr.bf16.mxu0 %v1875_v24 }
 0x3a0   : > { %v1798_v39 = vld [vmem:[#allocation2] ss:$8 sps:$4 sm:$0xff]   ;;  %v1348_v5 = vpop.permute.xlu0 %1347 }
 0x3a1   : > { %1694 = vmatpush3.bf16.msra.mxu0 %v1798_v39 }
 0x3a2   : > { %v807_v45 = vpop.permute.xlu1 %806 }
 0x3a4   : > { %1696 = vmatmul.mubr.msk.bf16.vlgmr.msra.gmra.mxu0 %vm2352_vm12, %v1799_v40 }
 0x3a6   : > { %v991_v24 = vpop.permute.xlu1 %990 }
 0x3aa   : > { %v1170_v55 = vpop.permute.xlu1 %1169 }
 0x3ae   : > { %v1343_v1 = vpop.permute.xlu1 %1342 }
 0x442   : > { %v869_v42 = vpop.f32.mrf.mxu1 }
 0x443   : > { %v870_v43 = vadd.f32 %v869_v42, %v802_v41 }
 0x444   : > { %v1667_v44 = vpop.f32.mrf.mxu1 }
 0x445   : > { %876 = vst [vmem:[%s2080_s7] sm:$0xff] %v870_v43 }
 0x446   : > { %v872_v47 = vpop.f32.mrf.mxu1 }
 0x447   : > { %v873_v48 = vadd.f32 %v872_v47, %v807_v45 }
 0x448   : > { %v1668_v34 = vpop.f32.mrf.mxu1 }
 0x449   : > { %877 = vst [vmem:[%s2080_s7 + $0x8] sm:$0xff] %v873_v48 }
 0x44c   : > { %v1472_v9 = vld [vmem:[%s2080_s7] sm:$0xff] (%p1958_p5) }
 0x44d   : > { %1473 = vst [vmem:[%s1429_s21] sm:$0xff] (%p1958_p5), %v1472_v9 }
 0x450   : > { %v1474_v10 = vld [vmem:[%s2080_s7 + $0x8] sm:$0xff] (%p1958_p5) }
 0x451   : > { %1475 = vst [vmem:[%s1429_s21 + $0x10] sm:$0xff] (%p1958_p5), %v1474_v10 }
 0x456   : > { %v1058_v49 = vpop.f32.mrf.mxu0 }
 0x457   : > { %v1059_v50 = vadd.f32 %v1058_v49, %v991_v24 }
 0x458   : > { %v1677_v46 = vpop.f32.mrf.mxu0 }
 0x459   : > { %1065 = vst [vmem:[%s2080_s7 + $0x10] sm:$0xff] %v1059_v50 }
 0x45a   : > { %v1061_v52 = vpop.f32.mrf.mxu0 }
 0x45b   : > { %v1062_v53 = vadd.f32 %v1061_v52, %v996_v51 }
 0x45c   : > { %v1678_v54 = vpop.f32.mrf.mxu0 }
 0x45d   : > { %1066 = vst [vmem:[%s2080_s7 + $0x18] sm:$0xff] %v1062_v53 }
 0x45e   : > { %v1237_v59 = vpop.f32.mrf.mxu1 }
 0x45f   : > { %v1238_v60 = vadd.f32 %v1237_v59, %v1170_v55 }
 0x460   : > { %v1687_v61 = vpop.f32.mrf.mxu1  ;;  %v1476_v11 = vld [vmem:[%s2080_s7 + $0x10] sm:$0xff] (%p1958_p5) }
 0x461   : > { %1244 = vst [vmem:[%s2080_s7 + $0x20] sm:$0xff] %v1238_v60  ;;  %1477 = vst [vmem:[%s1429_s21 + $0x20] sm:$0xff] (%p1958_p5), %v1476_v11 }
 0x462   : > { %v1240_v58 = vpop.f32.mrf.mxu1 }
 0x463   : > { %v1241_v63 = vadd.f32 %v1240_v58, %v1175_v62 }
 0x464   : > { %v1688_v0 = vpop.f32.mrf.mxu1  ;;  %v1410_v2 = vpop.f32.mrf.mxu0  ;;  %v1478_v12 = vld [vmem:[%s2080_s7 + $0x18] sm:$0xff] (%p1958_p5) }
 0x465   : > { %1245 = vst [vmem:[%s2080_s7 + $0x28] sm:$0xff] %v1241_v63  ;;  %v1411_v3 = vadd.f32 %v1410_v2, %v1343_v1  ;;  %1479 = vst [vmem:[%s1429_s21 + $0x30] sm:$0xff] (%p1958_p5), %v1478_v12 }
 0x466   : > { %v1697_v4 = vpop.f32.mrf.mxu0 }
 0x467   : > { %1417 = vst [vmem:[%s2080_s7 + $0x30] sm:$0xff] %v1411_v3  ;;  %1425 = sbr.rel (!%p1958_p5) target bundleno = 1140 (0x474), region = 56 }
 0x468   : > { %v1413_v6 = vpop.f32.mrf.mxu0  ;;  %v1480_v13 = vld [vmem:[%s2080_s7 + $0x20] sm:$0xff] (%p1958_p5) }
 0x469   : > { %v1414_v7 = vadd.f32 %v1413_v6, %v1348_v5  ;;  %1481 = vst [vmem:[%s1429_s21 + $0x40] sm:$0xff] (%p1958_p5), %v1480_v13 }
 0x46a   : > { %v1698_v8 = vpop.f32.mrf.mxu0 }
 0x46b   : > { %1418 = vst [vmem:[%s2080_s7 + $0x38] sm:$0xff] %v1414_v7 }
 0x46c   : > { %v1482_v14 = vld [vmem:[%s2080_s7 + $0x28] sm:$0xff] }
 0x46d   : > { %1483 = vst [vmem:[%s1429_s21 + $0x50] sm:$0xff] %v1482_v14 }
 0x46e   : > { %v1484_v15 = vld [vmem:[%s2080_s7 + $0x30] sm:$0xff] }
 0x46f   : > { %1485 = vst [vmem:[%s1429_s21 + $0x60] sm:$0xff] %v1484_v15 }
 0x472   : > { %v1486_v16 = vld [vmem:[%s2080_s7 + $0x38] sm:$0xff] }
 0x473   : > { %1487 = vst [vmem:[%s1429_s21 + $0x70] sm:$0xff] %v1486_v16 }
 0x474 PF: > { %s16_s27 = sadd.s32 1, %s1854_s27   ;;  %s2353_s21 = smov %s1834_s22 }
 0x475   : > { %p13_p13 = scmp.ge.s32.totalorder %s16_s27, 6   ;;  %s2354_s22 = smov %s1969_s12 }
 0x476   : > { %s2355_s23 = smov %s1846_s25  ;;  %s2356_s24 = smov %s1850_s26 }
 0x477   : > { %s2357_s25 = smov %s2360_s28  ;;  %s2358_s26 = smov %s2364_s29 }
 0x478   :  { %15 = sbr.rel (!%p13_p13) target bundleno = 4 (0x4), region = 120 }

</bundles_post_ra>
